<compile_context>
chip_gen: v6e
topology: v6e:2x2x1
jax: 0.10.0
libtpu: 0.0.40
codegen_flags: <defaults>
</compile_context>

<pallas_src>
import functools

import jax
import jax.numpy as jnp
from jax.experimental import pallas as pl
from jax.experimental.pallas import tpu as pltpu

HIDDEN = 128
FC1 = 64


def _pick_chunk(T, Bp, D):
    """Largest time-chunk keeping the per-chunk VMEM working set ~8 MiB."""
    budget = 8 * 1024 * 1024
    # f32 gates row (4H*4B) + double-buffered bf16 x row (2*D*2B), per padded-batch row.
    per_row = 4 * HIDDEN * 4 + 2 * D * 2
    tc = max(1, min(T, budget // (per_row * Bp), 256))
    return int(tc)


def _lstm_kernel(x_ref, wx_ref, wh_ref, b_ref, w1_ref, b1_ref, w2_ref, b2_ref,
                 out_ref, gx_sc, h_sc, c_sc, *, seq_len, chunk, batch):
    """One grid step = one time chunk of the recurrence.

    x_ref:  (chunk*batch, D) bf16, time-major slab for this chunk
    out_ref: (batch, 128) f32 — sigmoid output in lane 0 (written on last step)
    gx_sc:  (chunk*batch, 4H) f32 input-projection scratch
    h_sc/c_sc: (batch, H) f32 carry across grid steps
    """
    H = HIDDEN
    t0 = pl.program_id(0)

    @pl.when(t0 == 0)
    def _():
        h_sc[...] = jnp.zeros_like(h_sc)
        c_sc[...] = jnp.zeros_like(c_sc)

    # Phase 1: input projection for the whole chunk — one MXU matmul,
    # bf16 operands, f32 accumulate.  Gate layout (PyTorch): [i | f | g | o].
    gx_sc[...] = (jnp.dot(x_ref[...], wx_ref[...],
                          preferred_element_type=jnp.float32)
                  + b_ref[...])

    base = t0 * chunk

    # Phase 2: serial recurrence over this chunk; h/c live in vregs.
    def step(t, carry):
        h, c = carry
        off = pl.multiple_of(t * batch, 8)
        gates = (jnp.dot(h.astype(jnp.bfloat16), wh_ref[...],
                         preferred_element_type=jnp.float32)
                 + gx_sc[pl.ds(off, batch), :])
        i_g = jax.nn.sigmoid(gates[:, 0 * H:1 * H])
        f_g = jax.nn.sigmoid(gates[:, 1 * H:2 * H])
        g_g = jnp.tanh(gates[:, 2 * H:3 * H])
        o_g = jax.nn.sigmoid(gates[:, 3 * H:4 * H])
        c_new = f_g * c + i_g * g_g
        h_new = o_g * jnp.tanh(c_new)
        # Mask timesteps in the zero-padded tail of the last chunk.
        valid = (base + t) < seq_len
        h = jnp.where(valid, h_new, h)
        c = jnp.where(valid, c_new, c)
        return (h, c)

    unroll = chunk if chunk <= 8 else (8 if batch <= 16 else 2)
    h_last, c_last = jax.lax.fori_loop(0, chunk, step, (h_sc[...], c_sc[...]),
                                       unroll=unroll)
    h_sc[...] = h_last
    c_sc[...] = c_last

    # Phase 3 (last chunk only): fused FC head, lane-padded to 128 so both
    # matmuls and the output store are lane-dense.  Real result is in lane 0.
    @pl.when(t0 == pl.num_programs(0) - 1)
    def _():
        z = jnp.maximum(
            jnp.dot(h_last, w1_ref[...], preferred_element_type=jnp.float32)
            + b1_ref[...], 0.0)
        y = jax.nn.sigmoid(
            jnp.dot(z, w2_ref[...], preferred_element_type=jnp.float32)
            + b2_ref[...])
        out_ref[...] = y


@jax.jit
def binary_lstm_forward(x, params):
    """x: (B, T, D) float32 -> (B, 1) float32 (matches the PyTorch forward)."""
    B, T, D = x.shape
    H = HIDDEN
    Bp = max(8, ((B + 7) // 8) * 8)            # pad batch to sublane granularity
    Tc = _pick_chunk(T, Bp, D)                 # time chunk
    n_chunks = -(-T // Tc)
    Tp = n_chunks * Tc                         # padded (masked) time extent

    # bf16 MXU operands for the recurrence; f32 everywhere else.
    wx = params["wx"].astype(jnp.bfloat16)     # (D, 4H)   = W_ih^T
    wh = params["wh"].astype(jnp.bfloat16)     # (H, 4H)   = W_hh^T
    b = params["b"]                            # (1, 4H)   = b_ih + b_hh
    # FC head weights zero-padded to lane width 128 (extra lanes produce 0 /
    # sigmoid(0) and are sliced away).
    w1_p = jnp.pad(params["w1"], ((0, 0), (0, 128 - FC1)))      # (H, 128)
    b1_p = jnp.pad(params["b1"], ((0, 0), (0, 128 - FC1)))      # (1, 128)
    w2_p = jnp.pad(params["w2"], ((0, 128 - FC1), (0, 127)))    # (128, 128)
    b2_p = jnp.pad(params["b2"], ((0, 0), (0, 127)))            # (1, 128)

    # Pad batch + time with zero rows and flatten to time-major (Tp*Bp, D), bf16.
    x_p = jnp.pad(x, ((0, Bp - B), (0, Tp - T), (0, 0)))
    x_tm = jnp.transpose(x_p, (1, 0, 2)).reshape(Tp * Bp, D).astype(jnp.bfloat16)

    kernel = functools.partial(_lstm_kernel, seq_len=T, chunk=Tc, batch=Bp)

    grid_spec = pltpu.PrefetchScalarGridSpec(
        num_scalar_prefetch=0,
        grid=(n_chunks,),
        in_specs=[
            pl.BlockSpec((Tc * Bp, D), lambda t: (t, 0)),          # x chunk (time-major)
            pl.BlockSpec((D, 4 * H), lambda t: (0, 0)),            # W_ih^T (bf16)
            pl.BlockSpec((H, 4 * H), lambda t: (0, 0)),            # W_hh^T (bf16)
            pl.BlockSpec((1, 4 * H), lambda t: (0, 0)),            # bias (f32)
            pl.BlockSpec((H, 128), lambda t: (0, 0)),              # w1 padded
            pl.BlockSpec((1, 128), lambda t: (0, 0)),              # b1 padded
            pl.BlockSpec((128, 128), lambda t: (0, 0)),            # w2 padded
            pl.BlockSpec((1, 128), lambda t: (0, 0)),              # b2 padded
        ],
        out_specs=pl.BlockSpec((Bp, 128), lambda t: (0, 0)),       # lane-dense output
        scratch_shapes=[
            pltpu.VMEM((Tc * Bp, 4 * H), jnp.float32),             # chunk gates_x
            pltpu.VMEM((Bp, H), jnp.float32),                      # h carry
            pltpu.VMEM((Bp, H), jnp.float32),                      # c carry
        ],
    )

    y_full = pl.pallas_call(
        kernel,
        out_shape=jax.ShapeDtypeStruct((Bp, 128), jnp.float32),
        grid_spec=grid_spec,
        compiler_params=pltpu.CompilerParams(
            dimension_semantics=("arbitrary",)),
    )(x_tm, wx, wh, b, w1_p, b1_p, w2_p, b2_p)

    return y_full[:B, :1]                       # drop padded rows / lanes


def init_params(key, input_size, hidden_size=HIDDEN):
    """Deterministic synthetic init (mirrors the PyTorch parameter shapes)."""
    ks = jax.random.split(key, 8)
    k = 1.0 / jnp.sqrt(hidden_size)
    # nn.LSTM params: W_ih (4H, D), W_hh (4H, H), b_ih (4H,), b_hh (4H,)
    w_ih = jax.random.uniform(ks[0], (4 * hidden_size, input_size), jnp.float32, -k, k)
    w_hh = jax.random.uniform(ks[1], (4 * hidden_size, hidden_size), jnp.float32, -k, k)
    b_ih = jax.random.uniform(ks[2], (4 * hidden_size,), jnp.float32, -k, k)
    b_hh = jax.random.uniform(ks[3], (4 * hidden_size,), jnp.float32, -k, k)
    # fc: Linear(128, 64) xavier_normal / zero bias, Linear(64, 1) xavier_normal / zero bias
    std1 = jnp.sqrt(2.0 / (hidden_size + FC1))
    std2 = jnp.sqrt(2.0 / (FC1 + 1))
    w1 = std1 * jax.random.normal(ks[4], (FC1, hidden_size), jnp.float32)
    w2 = std2 * jax.random.normal(ks[5], (1, FC1), jnp.float32)
    b1 = jnp.zeros((FC1,), jnp.float32)
    b2 = jnp.zeros((1,), jnp.float32)
    return {
        "wx": w_ih.T,                      # (D, 4H)
        "wh": w_hh.T,                      # (H, 4H)
        "b": (b_ih + b_hh)[None, :],       # (1, 4H)
        "w1": w1.T,                        # (H, 64)
        "b1": b1[None, :],                 # (1, 64)
        "w2": w2.T,                        # (64, 1)
        "b2": b2[None, :],                 # (1, 1)
    }


def reference_forward(x, params):
    """Pure-JAX f32 reference of the PyTorch forward."""
    B, T, D = x.shape
    H = HIDDEN

    def step(carry, x_t):
        h, c = carry
        gates = x_t @ params["wx"] + h @ params["wh"] + params["b"]
        i_g = jax.nn.sigmoid(gates[:, 0 * H:1 * H])
        f_g = jax.nn.sigmoid(gates[:, 1 * H:2 * H])
        g_g = jnp.tanh(gates[:, 2 * H:3 * H])
        o_g = jax.nn.sigmoid(gates[:, 3 * H:4 * H])
        c = f_g * c + i_g * g_g
        h = o_g * jnp.tanh(c)
        return (h, c), None

    h0 = jnp.zeros((B, H), jnp.float32)
    c0 = jnp.zeros((B, H), jnp.float32)
    (h_last, _), _ = jax.lax.scan(step, (h0, c0), jnp.transpose(x, (1, 0, 2)))
    z = jnp.maximum(h_last @ params["w1"] + params["b1"], 0.0)
    return jax.nn.sigmoid(z @ params["w2"] + params["b2"])


if __name__ == "__main__":
    B, T, D = 2, 8, 16
    key = jax.random.PRNGKey(0)
    kx, kp = jax.random.split(key)
    x = jax.random.normal(kx, (B, T, D), jnp.float32)
    params = init_params(kp, input_size=D)

    out = binary_lstm_forward(x, params)
    out = jax.block_until_ready(out)

    ref = reference_forward(x, params)
    assert out.shape == (B, 1), out.shape
    # bf16 MXU operands in the recurrence -> looser tolerance than pure f32.
    assert jnp.allclose(out, ref, rtol=2e-2, atol=1e-2), (out, ref)

    print("KERNEL_OK")
</pallas_src>

<mosaic_0001>
module attributes {stable_mosaic.version = 11 : i64} {
  func.func @_lstm_kernel(%arg0: i32, %arg1: memref<64x16xbf16, #tpu.memory_space<vmem>>, %arg2: memref<16x512xbf16, #tpu.memory_space<vmem>>, %arg3: memref<128x512xbf16, #tpu.memory_space<vmem>>, %arg4: memref<1x512xf32, #tpu.memory_space<vmem>>, %arg5: memref<128x128xf32, #tpu.memory_space<vmem>>, %arg6: memref<1x128xf32, #tpu.memory_space<vmem>>, %arg7: memref<128x128xf32, #tpu.memory_space<vmem>>, %arg8: memref<1x128xf32, #tpu.memory_space<vmem>>, %arg9: memref<8x128xf32, #tpu.memory_space<vmem>>, %arg10: memref<64x512xf32, #tpu.memory_space<vmem>>, %arg11: memref<8x128xf32, #tpu.memory_space<vmem>>, %arg12: memref<8x128xf32, #tpu.memory_space<vmem>>) attributes {dimension_semantics = [#tpu.dimension_semantics<arbitrary>], iteration_bounds = array<i64: 1>, scalar_prefetch = 0 : i64, scratch_operands = 3 : i64, tpu.core_type = #tpu.core_type<tc>, window_params = [{transform_indices = @transform_0, window_bounds = array<i64: 64, 16>}, {pipeline_mode = #tpu.pipeline_mode<synchronous>, transform_indices = @transform_1, window_bounds = array<i64: 16, 512>}, {pipeline_mode = #tpu.pipeline_mode<synchronous>, transform_indices = @transform_2, window_bounds = array<i64: 128, 512>}, {pipeline_mode = #tpu.pipeline_mode<synchronous>, transform_indices = @transform_3, window_bounds = array<i64: 1, 512>}, {pipeline_mode = #tpu.pipeline_mode<synchronous>, transform_indices = @transform_4, window_bounds = array<i64: 128, 128>}, {pipeline_mode = #tpu.pipeline_mode<synchronous>, transform_indices = @transform_5, window_bounds = array<i64: 1, 128>}, {pipeline_mode = #tpu.pipeline_mode<synchronous>, transform_indices = @transform_6, window_bounds = array<i64: 128, 128>}, {pipeline_mode = #tpu.pipeline_mode<synchronous>, transform_indices = @transform_7, window_bounds = array<i64: 1, 128>}, {pipeline_mode = #tpu.pipeline_mode<synchronous>, transform_indices = @transform_8, window_bounds = array<i64: 8, 128>}]} {
    %c0_i32 = arith.constant 0 : i32
    %0 = arith.cmpi eq, %arg0, %c0_i32 : i32
    %1 = arith.extui %0 : i1 to i32
    %c0_i32_0 = arith.constant 0 : i32
    %2 = arith.cmpi ne, %1, %c0_i32_0 : i32
    scf.if %2 {
      %cst_92 = arith.constant 0.000000e+00 : f32
      %314 = vector.broadcast %cst_92 : f32 to vector<8x128xf32>
      %c0_93 = arith.constant 0 : index
      %c0_94 = arith.constant 0 : index
      %315 = vector.load %arg11[%c0_93, %c0_94] : memref<8x128xf32, #tpu.memory_space<vmem>>, vector<8x128xf32>
      tpu.vector_store %arg11[%c0_93, %c0_94], %314 {strides = array<i32>} : memref<8x128xf32, #tpu.memory_space<vmem>>, vector<8x128xf32>,
      %cst_95 = arith.constant 0.000000e+00 : f32
      %316 = vector.broadcast %cst_95 : f32 to vector<8x128xf32>
      %c0_96 = arith.constant 0 : index
      %c0_97 = arith.constant 0 : index
      %317 = vector.load %arg12[%c0_96, %c0_97] : memref<8x128xf32, #tpu.memory_space<vmem>>, vector<8x128xf32>
      tpu.vector_store %arg12[%c0_96, %c0_97], %316 {strides = array<i32>} : memref<8x128xf32, #tpu.memory_space<vmem>>, vector<8x128xf32>,
    } else {
    }
    %c0 = arith.constant 0 : index
    %c0_1 = arith.constant 0 : index
    %3 = vector.load %arg1[%c0, %c0_1] : memref<64x16xbf16, #tpu.memory_space<vmem>>, vector<64x16xbf16>
    %c0_2 = arith.constant 0 : index
    %c0_3 = arith.constant 0 : index
    %4 = vector.load %arg2[%c0_2, %c0_3] : memref<16x512xbf16, #tpu.memory_space<vmem>>, vector<16x512xbf16>
    %cst = arith.constant dense<0.000000e+00> : vector<64x512xf32>
    %5 = tpu.matmul %3, %4, %cst {dimension_numbers = #tpu.dot_dimension_numbers<[1], [0], [0], [1], [0, 0, 1, 1], [], []>} : vector<64x16xbf16>, vector<16x512xbf16>, vector<64x512xf32> -> vector<64x512xf32>
    %c0_4 = arith.constant 0 : index
    %c0_5 = arith.constant 0 : index
    %6 = vector.load %arg4[%c0_4, %c0_5] : memref<1x512xf32, #tpu.memory_space<vmem>>, vector<1x512xf32>
    %7 = vector.broadcast %6 : vector<1x512xf32> to vector<64x512xf32>
    %8 = arith.addf %5, %7 : vector<64x512xf32>
    %c0_6 = arith.constant 0 : index
    %c0_7 = arith.constant 0 : index
    %9 = vector.load %arg10[%c0_6, %c0_7] : memref<64x512xf32, #tpu.memory_space<vmem>>, vector<64x512xf32>
    tpu.vector_store %arg10[%c0_6, %c0_7], %8 {strides = array<i32>} : memref<64x512xf32, #tpu.memory_space<vmem>>, vector<64x512xf32>,
    %c8_i32 = arith.constant 8 : i32
    %10 = arith.muli %arg0, %c8_i32 : i32
    %c0_8 = arith.constant 0 : index
    %c0_9 = arith.constant 0 : index
    %11 = vector.load %arg11[%c0_8, %c0_9] : memref<8x128xf32, #tpu.memory_space<vmem>>, vector<8x128xf32>
    %c0_10 = arith.constant 0 : index
    %c0_11 = arith.constant 0 : index
    %12 = vector.load %arg12[%c0_10, %c0_11] : memref<8x128xf32, #tpu.memory_space<vmem>>, vector<8x128xf32>
    %c0_i32_12 = arith.constant 0 : i32
    %c8_i32_13 = arith.constant 8 : i32
    %13 = arith.muli %c0_i32_12, %c8_i32_13 : i32
    %14 = tpu.assume_multiple %13, 8 : i32
    %15 = arith.truncf %11 : vector<8x128xf32> to vector<8x128xbf16>
    %c0_14 = arith.constant 0 : index
    %c0_15 = arith.constant 0 : index
    %16 = vector.load %arg3[%c0_14, %c0_15] : memref<128x512xbf16, #tpu.memory_space<vmem>>, vector<128x512xbf16>
    %cst_16 = arith.constant dense<0.000000e+00> : vector<8x512xf32>
    %17 = tpu.matmul %15, %16, %cst_16 {dimension_numbers = #tpu.dot_dimension_numbers<[1], [0], [0], [1], [0, 0, 1, 1], [], []>} : vector<8x128xbf16>, vector<128x512xbf16>, vector<8x512xf32> -> vector<8x512xf32>
    %18 = arith.index_cast %14 : i32 to index
    %c0_17 = arith.constant 0 : index
    %19 = vector.load %arg10[%18, %c0_17] : memref<64x512xf32, #tpu.memory_space<vmem>>, vector<8x512xf32>
    %20 = arith.addf %17, %19 : vector<8x512xf32>
    %21 = vector.extract_strided_slice %20 {offsets = [0, 0], sizes = [8, 128], strides = [1, 1]} : vector<8x512xf32> to vector<8x128xf32>
    %22 = arith.negf %21 : vector<8x128xf32>
    %23 = math.exp %22 : vector<8x128xf32>
    %cst_18 = arith.constant 1.000000e+00 : f32
    %24 = vector.broadcast %cst_18 : f32 to vector<8x128xf32>
    %25 = arith.addf %24, %23 : vector<8x128xf32>
    %26 = arith.divf %24, %25 : vector<8x128xf32>
    %27 = vector.extract_strided_slice %20 {offsets = [0, 128], sizes = [8, 128], strides = [1, 1]} : vector<8x512xf32> to vector<8x128xf32>
    %28 = arith.negf %27 : vector<8x128xf32>
    %29 = math.exp %28 : vector<8x128xf32>
    %cst_19 = arith.constant 1.000000e+00 : f32
    %30 = vector.broadcast %cst_19 : f32 to vector<8x128xf32>
    %31 = arith.addf %30, %29 : vector<8x128xf32>
    %32 = arith.divf %30, %31 : vector<8x128xf32>
    %33 = vector.extract_strided_slice %20 {offsets = [0, 256], sizes = [8, 128], strides = [1, 1]} : vector<8x512xf32> to vector<8x128xf32>
    %34 = math.tanh %33 : vector<8x128xf32>
    %35 = vector.extract_strided_slice %20 {offsets = [0, 384], sizes = [8, 128], strides = [1, 1]} : vector<8x512xf32> to vector<8x128xf32>
    %36 = arith.negf %35 : vector<8x128xf32>
    %37 = math.exp %36 : vector<8x128xf32>
    %cst_20 = arith.constant 1.000000e+00 : f32
    %38 = vector.broadcast %cst_20 : f32 to vector<8x128xf32>
    %39 = arith.addf %38, %37 : vector<8x128xf32>
    %40 = arith.divf %38, %39 : vector<8x128xf32>
    %41 = arith.mulf %32, %12 : vector<8x128xf32>
    %42 = arith.mulf %26, %34 : vector<8x128xf32>
    %43 = arith.addf %41, %42 : vector<8x128xf32>
    %44 = math.tanh %43 : vector<8x128xf32>
    %45 = arith.mulf %40, %44 : vector<8x128xf32>
    %46 = arith.addi %10, %c0_i32_12 : i32
    %c8_i32_21 = arith.constant 8 : i32
    %47 = arith.cmpi slt, %46, %c8_i32_21 : i32
    %48 = arith.select %47, %45, %11 : vector<8x128xf32>
    %49 = arith.select %47, %43, %12 : vector<8x128xf32>
    %c1_i32 = arith.constant 1 : i32
    %c8_i32_22 = arith.constant 8 : i32
    %50 = arith.muli %c1_i32, %c8_i32_22 : i32
    %51 = tpu.assume_multiple %50, 8 : i32
    %52 = arith.truncf %48 : vector<8x128xf32> to vector<8x128xbf16>
    %c0_23 = arith.constant 0 : index
    %c0_24 = arith.constant 0 : index
    %53 = vector.load %arg3[%c0_23, %c0_24] : memref<128x512xbf16, #tpu.memory_space<vmem>>, vector<128x512xbf16>
    %cst_25 = arith.constant dense<0.000000e+00> : vector<8x512xf32>
    %54 = tpu.matmul %52, %53, %cst_25 {dimension_numbers = #tpu.dot_dimension_numbers<[1], [0], [0], [1], [0, 0, 1, 1], [], []>} : vector<8x128xbf16>, vector<128x512xbf16>, vector<8x512xf32> -> vector<8x512xf32>
    %55 = arith.index_cast %51 : i32 to index
    %c0_26 = arith.constant 0 : index
    %56 = vector.load %arg10[%55, %c0_26] : memref<64x512xf32, #tpu.memory_space<vmem>>, vector<8x512xf32>
    %57 = arith.addf %54, %56 : vector<8x512xf32>
    %58 = vector.extract_strided_slice %57 {offsets = [0, 0], sizes = [8, 128], strides = [1, 1]} : vector<8x512xf32> to vector<8x128xf32>
    %59 = arith.negf %58 : vector<8x128xf32>
    %60 = math.exp %59 : vector<8x128xf32>
    %cst_27 = arith.constant 1.000000e+00 : f32
    %61 = vector.broadcast %cst_27 : f32 to vector<8x128xf32>
    %62 = arith.addf %61, %60 : vector<8x128xf32>
    %63 = arith.divf %61, %62 : vector<8x128xf32>
    %64 = vector.extract_strided_slice %57 {offsets = [0, 128], sizes = [8, 128], strides = [1, 1]} : vector<8x512xf32> to vector<8x128xf32>
    %65 = arith.negf %64 : vector<8x128xf32>
    %66 = math.exp %65 : vector<8x128xf32>
    %cst_28 = arith.constant 1.000000e+00 : f32
    %67 = vector.broadcast %cst_28 : f32 to vector<8x128xf32>
    %68 = arith.addf %67, %66 : vector<8x128xf32>
    %69 = arith.divf %67, %68 : vector<8x128xf32>
    %70 = vector.extract_strided_slice %57 {offsets = [0, 256], sizes = [8, 128], strides = [1, 1]} : vector<8x512xf32> to vector<8x128xf32>
    %71 = math.tanh %70 : vector<8x128xf32>
    %72 = vector.extract_strided_slice %57 {offsets = [0, 384], sizes = [8, 128], strides = [1, 1]} : vector<8x512xf32> to vector<8x128xf32>
    %73 = arith.negf %72 : vector<8x128xf32>
    %74 = math.exp %73 : vector<8x128xf32>
    %cst_29 = arith.constant 1.000000e+00 : f32
    %75 = vector.broadcast %cst_29 : f32 to vector<8x128xf32>
    %76 = arith.addf %75, %74 : vector<8x128xf32>
    %77 = arith.divf %75, %76 : vector<8x128xf32>
    %78 = arith.mulf %69, %49 : vector<8x128xf32>
    %79 = arith.mulf %63, %71 : vector<8x128xf32>
    %80 = arith.addf %78, %79 : vector<8x128xf32>
    %81 = math.tanh %80 : vector<8x128xf32>
    %82 = arith.mulf %77, %81 : vector<8x128xf32>
    %83 = arith.addi %10, %c1_i32 : i32
    %c8_i32_30 = arith.constant 8 : i32
    %84 = arith.cmpi slt, %83, %c8_i32_30 : i32
    %85 = arith.select %84, %82, %48 : vector<8x128xf32>
    %86 = arith.select %84, %80, %49 : vector<8x128xf32>
    %c2_i32 = arith.constant 2 : i32
    %c8_i32_31 = arith.constant 8 : i32
    %87 = arith.muli %c2_i32, %c8_i32_31 : i32
    %88 = tpu.assume_multiple %87, 8 : i32
    %89 = arith.truncf %85 : vector<8x128xf32> to vector<8x128xbf16>
    %c0_32 = arith.constant 0 : index
    %c0_33 = arith.constant 0 : index
    %90 = vector.load %arg3[%c0_32, %c0_33] : memref<128x512xbf16, #tpu.memory_space<vmem>>, vector<128x512xbf16>
    %cst_34 = arith.constant dense<0.000000e+00> : vector<8x512xf32>
    %91 = tpu.matmul %89, %90, %cst_34 {dimension_numbers = #tpu.dot_dimension_numbers<[1], [0], [0], [1], [0, 0, 1, 1], [], []>} : vector<8x128xbf16>, vector<128x512xbf16>, vector<8x512xf32> -> vector<8x512xf32>
    %92 = arith.index_cast %88 : i32 to index
    %c0_35 = arith.constant 0 : index
    %93 = vector.load %arg10[%92, %c0_35] : memref<64x512xf32, #tpu.memory_space<vmem>>, vector<8x512xf32>
    %94 = arith.addf %91, %93 : vector<8x512xf32>
    %95 = vector.extract_strided_slice %94 {offsets = [0, 0], sizes = [8, 128], strides = [1, 1]} : vector<8x512xf32> to vector<8x128xf32>
    %96 = arith.negf %95 : vector<8x128xf32>
    %97 = math.exp %96 : vector<8x128xf32>
    %cst_36 = arith.constant 1.000000e+00 : f32
    %98 = vector.broadcast %cst_36 : f32 to vector<8x128xf32>
    %99 = arith.addf %98, %97 : vector<8x128xf32>
    %100 = arith.divf %98, %99 : vector<8x128xf32>
    %101 = vector.extract_strided_slice %94 {offsets = [0, 128], sizes = [8, 128], strides = [1, 1]} : vector<8x512xf32> to vector<8x128xf32>
    %102 = arith.negf %101 : vector<8x128xf32>
    %103 = math.exp %102 : vector<8x128xf32>
    %cst_37 = arith.constant 1.000000e+00 : f32
    %104 = vector.broadcast %cst_37 : f32 to vector<8x128xf32>
    %105 = arith.addf %104, %103 : vector<8x128xf32>
    %106 = arith.divf %104, %105 : vector<8x128xf32>
    %107 = vector.extract_strided_slice %94 {offsets = [0, 256], sizes = [8, 128], strides = [1, 1]} : vector<8x512xf32> to vector<8x128xf32>
    %108 = math.tanh %107 : vector<8x128xf32>
    %109 = vector.extract_strided_slice %94 {offsets = [0, 384], sizes = [8, 128], strides = [1, 1]} : vector<8x512xf32> to vector<8x128xf32>
    %110 = arith.negf %109 : vector<8x128xf32>
    %111 = math.exp %110 : vector<8x128xf32>
    %cst_38 = arith.constant 1.000000e+00 : f32
    %112 = vector.broadcast %cst_38 : f32 to vector<8x128xf32>
    %113 = arith.addf %112, %111 : vector<8x128xf32>
    %114 = arith.divf %112, %113 : vector<8x128xf32>
    %115 = arith.mulf %106, %86 : vector<8x128xf32>
    %116 = arith.mulf %100, %108 : vector<8x128xf32>
    %117 = arith.addf %115, %116 : vector<8x128xf32>
    %118 = math.tanh %117 : vector<8x128xf32>
    %119 = arith.mulf %114, %118 : vector<8x128xf32>
    %120 = arith.addi %10, %c2_i32 : i32
    %c8_i32_39 = arith.constant 8 : i32
    %121 = arith.cmpi slt, %120, %c8_i32_39 : i32
    %122 = arith.select %121, %119, %85 : vector<8x128xf32>
    %123 = arith.select %121, %117, %86 : vector<8x128xf32>
    %c3_i32 = arith.constant 3 : i32
    %c8_i32_40 = arith.constant 8 : i32
    %124 = arith.muli %c3_i32, %c8_i32_40 : i32
    %125 = tpu.assume_multiple %124, 8 : i32
    %126 = arith.truncf %122 : vector<8x128xf32> to vector<8x128xbf16>
    %c0_41 = arith.constant 0 : index
    %c0_42 = arith.constant 0 : index
    %127 = vector.load %arg3[%c0_41, %c0_42] : memref<128x512xbf16, #tpu.memory_space<vmem>>, vector<128x512xbf16>
    %cst_43 = arith.constant dense<0.000000e+00> : vector<8x512xf32>
    %128 = tpu.matmul %126, %127, %cst_43 {dimension_numbers = #tpu.dot_dimension_numbers<[1], [0], [0], [1], [0, 0, 1, 1], [], []>} : vector<8x128xbf16>, vector<128x512xbf16>, vector<8x512xf32> -> vector<8x512xf32>
    %129 = arith.index_cast %125 : i32 to index
    %c0_44 = arith.constant 0 : index
    %130 = vector.load %arg10[%129, %c0_44] : memref<64x512xf32, #tpu.memory_space<vmem>>, vector<8x512xf32>
    %131 = arith.addf %128, %130 : vector<8x512xf32>
    %132 = vector.extract_strided_slice %131 {offsets = [0, 0], sizes = [8, 128], strides = [1, 1]} : vector<8x512xf32> to vector<8x128xf32>
    %133 = arith.negf %132 : vector<8x128xf32>
    %134 = math.exp %133 : vector<8x128xf32>
    %cst_45 = arith.constant 1.000000e+00 : f32
    %135 = vector.broadcast %cst_45 : f32 to vector<8x128xf32>
    %136 = arith.addf %135, %134 : vector<8x128xf32>
    %137 = arith.divf %135, %136 : vector<8x128xf32>
    %138 = vector.extract_strided_slice %131 {offsets = [0, 128], sizes = [8, 128], strides = [1, 1]} : vector<8x512xf32> to vector<8x128xf32>
    %139 = arith.negf %138 : vector<8x128xf32>
    %140 = math.exp %139 : vector<8x128xf32>
    %cst_46 = arith.constant 1.000000e+00 : f32
    %141 = vector.broadcast %cst_46 : f32 to vector<8x128xf32>
    %142 = arith.addf %141, %140 : vector<8x128xf32>
    %143 = arith.divf %141, %142 : vector<8x128xf32>
    %144 = vector.extract_strided_slice %131 {offsets = [0, 256], sizes = [8, 128], strides = [1, 1]} : vector<8x512xf32> to vector<8x128xf32>
    %145 = math.tanh %144 : vector<8x128xf32>
    %146 = vector.extract_strided_slice %131 {offsets = [0, 384], sizes = [8, 128], strides = [1, 1]} : vector<8x512xf32> to vector<8x128xf32>
    %147 = arith.negf %146 : vector<8x128xf32>
    %148 = math.exp %147 : vector<8x128xf32>
    %cst_47 = arith.constant 1.000000e+00 : f32
    %149 = vector.broadcast %cst_47 : f32 to vector<8x128xf32>
    %150 = arith.addf %149, %148 : vector<8x128xf32>
    %151 = arith.divf %149, %150 : vector<8x128xf32>
    %152 = arith.mulf %143, %123 : vector<8x128xf32>
    %153 = arith.mulf %137, %145 : vector<8x128xf32>
    %154 = arith.addf %152, %153 : vector<8x128xf32>
    %155 = math.tanh %154 : vector<8x128xf32>
    %156 = arith.mulf %151, %155 : vector<8x128xf32>
    %157 = arith.addi %10, %c3_i32 : i32
    %c8_i32_48 = arith.constant 8 : i32
    %158 = arith.cmpi slt, %157, %c8_i32_48 : i32
    %159 = arith.select %158, %156, %122 : vector<8x128xf32>
    %160 = arith.select %158, %154, %123 : vector<8x128xf32>
    %c4_i32 = arith.constant 4 : i32
    %c8_i32_49 = arith.constant 8 : i32
    %161 = arith.muli %c4_i32, %c8_i32_49 : i32
    %162 = tpu.assume_multiple %161, 8 : i32
    %163 = arith.truncf %159 : vector<8x128xf32> to vector<8x128xbf16>
    %c0_50 = arith.constant 0 : index
    %c0_51 = arith.constant 0 : index
    %164 = vector.load %arg3[%c0_50, %c0_51] : memref<128x512xbf16, #tpu.memory_space<vmem>>, vector<128x512xbf16>
    %cst_52 = arith.constant dense<0.000000e+00> : vector<8x512xf32>
    %165 = tpu.matmul %163, %164, %cst_52 {dimension_numbers = #tpu.dot_dimension_numbers<[1], [0], [0], [1], [0, 0, 1, 1], [], []>} : vector<8x128xbf16>, vector<128x512xbf16>, vector<8x512xf32> -> vector<8x512xf32>
    %166 = arith.index_cast %162 : i32 to index
    %c0_53 = arith.constant 0 : index
    %167 = vector.load %arg10[%166, %c0_53] : memref<64x512xf32, #tpu.memory_space<vmem>>, vector<8x512xf32>
    %168 = arith.addf %165, %167 : vector<8x512xf32>
    %169 = vector.extract_strided_slice %168 {offsets = [0, 0], sizes = [8, 128], strides = [1, 1]} : vector<8x512xf32> to vector<8x128xf32>
    %170 = arith.negf %169 : vector<8x128xf32>
    %171 = math.exp %170 : vector<8x128xf32>
    %cst_54 = arith.constant 1.000000e+00 : f32
    %172 = vector.broadcast %cst_54 : f32 to vector<8x128xf32>
    %173 = arith.addf %172, %171 : vector<8x128xf32>
    %174 = arith.divf %172, %173 : vector<8x128xf32>
    %175 = vector.extract_strided_slice %168 {offsets = [0, 128], sizes = [8, 128], strides = [1, 1]} : vector<8x512xf32> to vector<8x128xf32>
    %176 = arith.negf %175 : vector<8x128xf32>
    %177 = math.exp %176 : vector<8x128xf32>
    %cst_55 = arith.constant 1.000000e+00 : f32
    %178 = vector.broadcast %cst_55 : f32 to vector<8x128xf32>
    %179 = arith.addf %178, %177 : vector<8x128xf32>
    %180 = arith.divf %178, %179 : vector<8x128xf32>
    %181 = vector.extract_strided_slice %168 {offsets = [0, 256], sizes = [8, 128], strides = [1, 1]} : vector<8x512xf32> to vector<8x128xf32>
    %182 = math.tanh %181 : vector<8x128xf32>
    %183 = vector.extract_strided_slice %168 {offsets = [0, 384], sizes = [8, 128], strides = [1, 1]} : vector<8x512xf32> to vector<8x128xf32>
    %184 = arith.negf %183 : vector<8x128xf32>
    %185 = math.exp %184 : vector<8x128xf32>
    %cst_56 = arith.constant 1.000000e+00 : f32
    %186 = vector.broadcast %cst_56 : f32 to vector<8x128xf32>
    %187 = arith.addf %186, %185 : vector<8x128xf32>
    %188 = arith.divf %186, %187 : vector<8x128xf32>
    %189 = arith.mulf %180, %160 : vector<8x128xf32>
    %190 = arith.mulf %174, %182 : vector<8x128xf32>
    %191 = arith.addf %189, %190 : vector<8x128xf32>
    %192 = math.tanh %191 : vector<8x128xf32>
    %193 = arith.mulf %188, %192 : vector<8x128xf32>
    %194 = arith.addi %10, %c4_i32 : i32
    %c8_i32_57 = arith.constant 8 : i32
    %195 = arith.cmpi slt, %194, %c8_i32_57 : i32
    %196 = arith.select %195, %193, %159 : vector<8x128xf32>
    %197 = arith.select %195, %191, %160 : vector<8x128xf32>
    %c5_i32 = arith.constant 5 : i32
    %c8_i32_58 = arith.constant 8 : i32
    %198 = arith.muli %c5_i32, %c8_i32_58 : i32
    %199 = tpu.assume_multiple %198, 8 : i32
    %200 = arith.truncf %196 : vector<8x128xf32> to vector<8x128xbf16>
    %c0_59 = arith.constant 0 : index
    %c0_60 = arith.constant 0 : index
    %201 = vector.load %arg3[%c0_59, %c0_60] : memref<128x512xbf16, #tpu.memory_space<vmem>>, vector<128x512xbf16>
    %cst_61 = arith.constant dense<0.000000e+00> : vector<8x512xf32>
    %202 = tpu.matmul %200, %201, %cst_61 {dimension_numbers = #tpu.dot_dimension_numbers<[1], [0], [0], [1], [0, 0, 1, 1], [], []>} : vector<8x128xbf16>, vector<128x512xbf16>, vector<8x512xf32> -> vector<8x512xf32>
    %203 = arith.index_cast %199 : i32 to index
    %c0_62 = arith.constant 0 : index
    %204 = vector.load %arg10[%203, %c0_62] : memref<64x512xf32, #tpu.memory_space<vmem>>, vector<8x512xf32>
    %205 = arith.addf %202, %204 : vector<8x512xf32>
    %206 = vector.extract_strided_slice %205 {offsets = [0, 0], sizes = [8, 128], strides = [1, 1]} : vector<8x512xf32> to vector<8x128xf32>
    %207 = arith.negf %206 : vector<8x128xf32>
    %208 = math.exp %207 : vector<8x128xf32>
    %cst_63 = arith.constant 1.000000e+00 : f32
    %209 = vector.broadcast %cst_63 : f32 to vector<8x128xf32>
    %210 = arith.addf %209, %208 : vector<8x128xf32>
    %211 = arith.divf %209, %210 : vector<8x128xf32>
    %212 = vector.extract_strided_slice %205 {offsets = [0, 128], sizes = [8, 128], strides = [1, 1]} : vector<8x512xf32> to vector<8x128xf32>
    %213 = arith.negf %212 : vector<8x128xf32>
    %214 = math.exp %213 : vector<8x128xf32>
    %cst_64 = arith.constant 1.000000e+00 : f32
    %215 = vector.broadcast %cst_64 : f32 to vector<8x128xf32>
    %216 = arith.addf %215, %214 : vector<8x128xf32>
    %217 = arith.divf %215, %216 : vector<8x128xf32>
    %218 = vector.extract_strided_slice %205 {offsets = [0, 256], sizes = [8, 128], strides = [1, 1]} : vector<8x512xf32> to vector<8x128xf32>
    %219 = math.tanh %218 : vector<8x128xf32>
    %220 = vector.extract_strided_slice %205 {offsets = [0, 384], sizes = [8, 128], strides = [1, 1]} : vector<8x512xf32> to vector<8x128xf32>
    %221 = arith.negf %220 : vector<8x128xf32>
    %222 = math.exp %221 : vector<8x128xf32>
    %cst_65 = arith.constant 1.000000e+00 : f32
    %223 = vector.broadcast %cst_65 : f32 to vector<8x128xf32>
    %224 = arith.addf %223, %222 : vector<8x128xf32>
    %225 = arith.divf %223, %224 : vector<8x128xf32>
    %226 = arith.mulf %217, %197 : vector<8x128xf32>
    %227 = arith.mulf %211, %219 : vector<8x128xf32>
    %228 = arith.addf %226, %227 : vector<8x128xf32>
    %229 = math.tanh %228 : vector<8x128xf32>
    %230 = arith.mulf %225, %229 : vector<8x128xf32>
    %231 = arith.addi %10, %c5_i32 : i32
    %c8_i32_66 = arith.constant 8 : i32
    %232 = arith.cmpi slt, %231, %c8_i32_66 : i32
    %233 = arith.select %232, %230, %196 : vector<8x128xf32>
    %234 = arith.select %232, %228, %197 : vector<8x128xf32>
    %c6_i32 = arith.constant 6 : i32
    %c8_i32_67 = arith.constant 8 : i32
    %235 = arith.muli %c6_i32, %c8_i32_67 : i32
    %236 = tpu.assume_multiple %235, 8 : i32
    %237 = arith.truncf %233 : vector<8x128xf32> to vector<8x128xbf16>
    %c0_68 = arith.constant 0 : index
    %c0_69 = arith.constant 0 : index
    %238 = vector.load %arg3[%c0_68, %c0_69] : memref<128x512xbf16, #tpu.memory_space<vmem>>, vector<128x512xbf16>
    %cst_70 = arith.constant dense<0.000000e+00> : vector<8x512xf32>
    %239 = tpu.matmul %237, %238, %cst_70 {dimension_numbers = #tpu.dot_dimension_numbers<[1], [0], [0], [1], [0, 0, 1, 1], [], []>} : vector<8x128xbf16>, vector<128x512xbf16>, vector<8x512xf32> -> vector<8x512xf32>
    %240 = arith.index_cast %236 : i32 to index
    %c0_71 = arith.constant 0 : index
    %241 = vector.load %arg10[%240, %c0_71] : memref<64x512xf32, #tpu.memory_space<vmem>>, vector<8x512xf32>
    %242 = arith.addf %239, %241 : vector<8x512xf32>
    %243 = vector.extract_strided_slice %242 {offsets = [0, 0], sizes = [8, 128], strides = [1, 1]} : vector<8x512xf32> to vector<8x128xf32>
    %244 = arith.negf %243 : vector<8x128xf32>
    %245 = math.exp %244 : vector<8x128xf32>
    %cst_72 = arith.constant 1.000000e+00 : f32
    %246 = vector.broadcast %cst_72 : f32 to vector<8x128xf32>
    %247 = arith.addf %246, %245 : vector<8x128xf32>
    %248 = arith.divf %246, %247 : vector<8x128xf32>
    %249 = vector.extract_strided_slice %242 {offsets = [0, 128], sizes = [8, 128], strides = [1, 1]} : vector<8x512xf32> to vector<8x128xf32>
    %250 = arith.negf %249 : vector<8x128xf32>
    %251 = math.exp %250 : vector<8x128xf32>
    %cst_73 = arith.constant 1.000000e+00 : f32
    %252 = vector.broadcast %cst_73 : f32 to vector<8x128xf32>
    %253 = arith.addf %252, %251 : vector<8x128xf32>
    %254 = arith.divf %252, %253 : vector<8x128xf32>
    %255 = vector.extract_strided_slice %242 {offsets = [0, 256], sizes = [8, 128], strides = [1, 1]} : vector<8x512xf32> to vector<8x128xf32>
    %256 = math.tanh %255 : vector<8x128xf32>
    %257 = vector.extract_strided_slice %242 {offsets = [0, 384], sizes = [8, 128], strides = [1, 1]} : vector<8x512xf32> to vector<8x128xf32>
    %258 = arith.negf %257 : vector<8x128xf32>
    %259 = math.exp %258 : vector<8x128xf32>
    %cst_74 = arith.constant 1.000000e+00 : f32
    %260 = vector.broadcast %cst_74 : f32 to vector<8x128xf32>
    %261 = arith.addf %260, %259 : vector<8x128xf32>
    %262 = arith.divf %260, %261 : vector<8x128xf32>
    %263 = arith.mulf %254, %234 : vector<8x128xf32>
    %264 = arith.mulf %248, %256 : vector<8x128xf32>
    %265 = arith.addf %263, %264 : vector<8x128xf32>
    %266 = math.tanh %265 : vector<8x128xf32>
    %267 = arith.mulf %262, %266 : vector<8x128xf32>
    %268 = arith.addi %10, %c6_i32 : i32
    %c8_i32_75 = arith.constant 8 : i32
    %269 = arith.cmpi slt, %268, %c8_i32_75 : i32
    %270 = arith.select %269, %267, %233 : vector<8x128xf32>
    %271 = arith.select %269, %265, %234 : vector<8x128xf32>
    %c7_i32 = arith.constant 7 : i32
    %c8_i32_76 = arith.constant 8 : i32
    %272 = arith.muli %c7_i32, %c8_i32_76 : i32
    %273 = tpu.assume_multiple %272, 8 : i32
    %274 = arith.truncf %270 : vector<8x128xf32> to vector<8x128xbf16>
    %c0_77 = arith.constant 0 : index
    %c0_78 = arith.constant 0 : index
    %275 = vector.load %arg3[%c0_77, %c0_78] : memref<128x512xbf16, #tpu.memory_space<vmem>>, vector<128x512xbf16>
    %cst_79 = arith.constant dense<0.000000e+00> : vector<8x512xf32>
    %276 = tpu.matmul %274, %275, %cst_79 {dimension_numbers = #tpu.dot_dimension_numbers<[1], [0], [0], [1], [0, 0, 1, 1], [], []>} : vector<8x128xbf16>, vector<128x512xbf16>, vector<8x512xf32> -> vector<8x512xf32>
    %277 = arith.index_cast %273 : i32 to index
    %c0_80 = arith.constant 0 : index
    %278 = vector.load %arg10[%277, %c0_80] : memref<64x512xf32, #tpu.memory_space<vmem>>, vector<8x512xf32>
    %279 = arith.addf %276, %278 : vector<8x512xf32>
    %280 = vector.extract_strided_slice %279 {offsets = [0, 0], sizes = [8, 128], strides = [1, 1]} : vector<8x512xf32> to vector<8x128xf32>
    %281 = arith.negf %280 : vector<8x128xf32>
    %282 = math.exp %281 : vector<8x128xf32>
    %cst_81 = arith.constant 1.000000e+00 : f32
    %283 = vector.broadcast %cst_81 : f32 to vector<8x128xf32>
    %284 = arith.addf %283, %282 : vector<8x128xf32>
    %285 = arith.divf %283, %284 : vector<8x128xf32>
    %286 = vector.extract_strided_slice %279 {offsets = [0, 128], sizes = [8, 128], strides = [1, 1]} : vector<8x512xf32> to vector<8x128xf32>
    %287 = arith.negf %286 : vector<8x128xf32>
    %288 = math.exp %287 : vector<8x128xf32>
    %cst_82 = arith.constant 1.000000e+00 : f32
    %289 = vector.broadcast %cst_82 : f32 to vector<8x128xf32>
    %290 = arith.addf %289, %288 : vector<8x128xf32>
    %291 = arith.divf %289, %290 : vector<8x128xf32>
    %292 = vector.extract_strided_slice %279 {offsets = [0, 256], sizes = [8, 128], strides = [1, 1]} : vector<8x512xf32> to vector<8x128xf32>
    %293 = math.tanh %292 : vector<8x128xf32>
    %294 = vector.extract_strided_slice %279 {offsets = [0, 384], sizes = [8, 128], strides = [1, 1]} : vector<8x512xf32> to vector<8x128xf32>
    %295 = arith.negf %294 : vector<8x128xf32>
    %296 = math.exp %295 : vector<8x128xf32>
    %cst_83 = arith.constant 1.000000e+00 : f32
    %297 = vector.broadcast %cst_83 : f32 to vector<8x128xf32>
    %298 = arith.addf %297, %296 : vector<8x128xf32>
    %299 = arith.divf %297, %298 : vector<8x128xf32>
    %300 = arith.mulf %291, %271 : vector<8x128xf32>
    %301 = arith.mulf %285, %293 : vector<8x128xf32>
    %302 = arith.addf %300, %301 : vector<8x128xf32>
    %303 = math.tanh %302 : vector<8x128xf32>
    %304 = arith.mulf %299, %303 : vector<8x128xf32>
    %305 = arith.addi %10, %c7_i32 : i32
    %c8_i32_84 = arith.constant 8 : i32
    %306 = arith.cmpi slt, %305, %c8_i32_84 : i32
    %307 = arith.select %306, %304, %270 : vector<8x128xf32>
    %308 = arith.select %306, %302, %271 : vector<8x128xf32>
    %c8_i32_85 = arith.constant 8 : i32
    %c0_86 = arith.constant 0 : index
    %c0_87 = arith.constant 0 : index
    %309 = vector.load %arg11[%c0_86, %c0_87] : memref<8x128xf32, #tpu.memory_space<vmem>>, vector<8x128xf32>
    tpu.vector_store %arg11[%c0_86, %c0_87], %307 {strides = array<i32>} : memref<8x128xf32, #tpu.memory_space<vmem>>, vector<8x128xf32>,
    %c0_88 = arith.constant 0 : index
    %c0_89 = arith.constant 0 : index
    %310 = vector.load %arg12[%c0_88, %c0_89] : memref<8x128xf32, #tpu.memory_space<vmem>>, vector<8x128xf32>
    tpu.vector_store %arg12[%c0_88, %c0_89], %308 {strides = array<i32>} : memref<8x128xf32, #tpu.memory_space<vmem>>, vector<8x128xf32>,
    %c0_i32_90 = arith.constant 0 : i32
    %311 = arith.cmpi eq, %arg0, %c0_i32_90 : i32
    %312 = arith.extui %311 : i1 to i32
    %c0_i32_91 = arith.constant 0 : i32
    %313 = arith.cmpi ne, %312, %c0_i32_91 : i32
    scf.if %313 {
      %c0_92 = arith.constant 0 : index
      %c0_93 = arith.constant 0 : index
      %314 = vector.load %arg5[%c0_92, %c0_93] : memref<128x128xf32, #tpu.memory_space<vmem>>, vector<128x128xf32>
      %cst_94 = arith.constant dense<0.000000e+00> : vector<8x128xf32>
      %315 = tpu.matmul %307, %314, %cst_94 {dimension_numbers = #tpu.dot_dimension_numbers<[1], [0], [0], [1], [0, 0, 1, 1], [], []>} : vector<8x128xf32>, vector<128x128xf32>, vector<8x128xf32> -> vector<8x128xf32>
      %c0_95 = arith.constant 0 : index
      %c0_96 = arith.constant 0 : index
      %316 = vector.load %arg6[%c0_95, %c0_96] : memref<1x128xf32, #tpu.memory_space<vmem>>, vector<1x128xf32>
      %317 = vector.broadcast %316 : vector<1x128xf32> to vector<8x128xf32>
      %318 = arith.addf %315, %317 : vector<8x128xf32>
      %cst_97 = arith.constant 0.000000e+00 : f32
      %319 = vector.broadcast %cst_97 : f32 to vector<8x128xf32>
      %320 = arith.maximumf %318, %319 : vector<8x128xf32>
      %c0_98 = arith.constant 0 : index
      %c0_99 = arith.constant 0 : index
      %321 = vector.load %arg7[%c0_98, %c0_99] : memref<128x128xf32, #tpu.memory_space<vmem>>, vector<128x128xf32>
      %cst_100 = arith.constant dense<0.000000e+00> : vector<8x128xf32>
      %322 = tpu.matmul %320, %321, %cst_100 {dimension_numbers = #tpu.dot_dimension_numbers<[1], [0], [0], [1], [0, 0, 1, 1], [], []>} : vector<8x128xf32>, vector<128x128xf32>, vector<8x128xf32> -> vector<8x128xf32>
      %c0_101 = arith.constant 0 : index
      %c0_102 = arith.constant 0 : index
      %323 = vector.load %arg8[%c0_101, %c0_102] : memref<1x128xf32, #tpu.memory_space<vmem>>, vector<1x128xf32>
      %324 = vector.broadcast %323 : vector<1x128xf32> to vector<8x128xf32>
      %325 = arith.addf %322, %324 : vector<8x128xf32>
      %326 = arith.negf %325 : vector<8x128xf32>
      %327 = math.exp %326 : vector<8x128xf32>
      %cst_103 = arith.constant 1.000000e+00 : f32
      %328 = vector.broadcast %cst_103 : f32 to vector<8x128xf32>
      %329 = arith.addf %328, %327 : vector<8x128xf32>
      %330 = arith.divf %328, %329 : vector<8x128xf32>
      %c0_104 = arith.constant 0 : index
      %c0_105 = arith.constant 0 : index
      %331 = vector.load %arg9[%c0_104, %c0_105] : memref<8x128xf32, #tpu.memory_space<vmem>>, vector<8x128xf32>
      tpu.vector_store %arg9[%c0_104, %c0_105], %330 {strides = array<i32>} : memref<8x128xf32, #tpu.memory_space<vmem>>, vector<8x128xf32>,
    } else {
    }
    return
  }
  func.func @transform_0(%arg0: i32) -> (i32, i32) {
    %c0_i32 = arith.constant 0 : i32
    %c0_i32_0 = arith.constant 0 : i32
    return %arg0, %c0_i32 : i32, i32
  }
  func.func @transform_1(%arg0: i32) -> (i32, i32) {
    %c0_i32 = arith.constant 0 : i32
    %c0_i32_0 = arith.constant 0 : i32
    %c0_i32_1 = arith.constant 0 : i32
    return %c0_i32, %c0_i32_0 : i32, i32
  }
  func.func @transform_2(%arg0: i32) -> (i32, i32) {
    %c0_i32 = arith.constant 0 : i32
    %c0_i32_0 = arith.constant 0 : i32
    %c0_i32_1 = arith.constant 0 : i32
    return %c0_i32, %c0_i32_0 : i32, i32
  }
  func.func @transform_3(%arg0: i32) -> (i32, i32) {
    %c0_i32 = arith.constant 0 : i32
    %c0_i32_0 = arith.constant 0 : i32
    %c0_i32_1 = arith.constant 0 : i32
    return %c0_i32, %c0_i32_0 : i32, i32
  }
  func.func @transform_4(%arg0: i32) -> (i32, i32) {
    %c0_i32 = arith.constant 0 : i32
    %c0_i32_0 = arith.constant 0 : i32
    %c0_i32_1 = arith.constant 0 : i32
    return %c0_i32, %c0_i32_0 : i32, i32
  }
  func.func @transform_5(%arg0: i32) -> (i32, i32) {
    %c0_i32 = arith.constant 0 : i32
    %c0_i32_0 = arith.constant 0 : i32
    %c0_i32_1 = arith.constant 0 : i32
    return %c0_i32, %c0_i32_0 : i32, i32
  }
  func.func @transform_6(%arg0: i32) -> (i32, i32) {
    %c0_i32 = arith.constant 0 : i32
    %c0_i32_0 = arith.constant 0 : i32
    %c0_i32_1 = arith.constant 0 : i32
    return %c0_i32, %c0_i32_0 : i32, i32
  }
  func.func @transform_7(%arg0: i32) -> (i32, i32) {
    %c0_i32 = arith.constant 0 : i32
    %c0_i32_0 = arith.constant 0 : i32
    %c0_i32_1 = arith.constant 0 : i32
    return %c0_i32, %c0_i32_0 : i32, i32
  }
  func.func @transform_8(%arg0: i32) -> (i32, i32) {
    %c0_i32 = arith.constant 0 : i32
    %c0_i32_0 = arith.constant 0 : i32
    %c0_i32_1 = arith.constant 0 : i32
    return %c0_i32, %c0_i32_0 : i32, i32
  }
}

</mosaic_0001>

<bundles_post_ra>
// kernel: binary_lstm_forward.1
= control target key start
LH: loop header
LB: loop body
LE: loop exit
PB: predicated region body
PF: predicated region fallthrough
CT: control target
= control target key end

     0   :  { %v3030_v1 = vmov 0   ;;  %vm110_vm0 = vcmask 130048   ;;  %v2079_v41 = vmov 0.0|0.0   ;;  %v50_v42 = vlaneseq  ;;  %s3021_s1 = inlined_call_operand.vmem [shape: bf16[16,512], index: 1, kind: input, shape index: {}]   ;;  %s3022_s0 = inlined_call_operand.vmem [shape: bf16[64,16], index: 0, kind: input, shape index: {}]   ;;  %s3023_s2 = inlined_call_operand.vmem [shape: bf16[128,512], index: 2, kind: input, shape index: {}]   ;;  %s3024_s3 = inlined_call_operand.vmem [shape: f32[1,512], index: 3, kind: input, shape index: {}]   ;;  %s3025_s4 = inlined_call_operand.vmem [shape: f32[128,128], index: 4, kind: input, shape index: {}]   ;;  %s3026_s6 = inlined_call_operand.vmem [shape: f32[128,128], index: 6, kind: input, shape index: {}]   ;;  %s3027_s5 = inlined_call_operand.vmem [shape: f32[1,128], index: 5, kind: input, shape index: {}]   ;;  %s3028_s7 = inlined_call_operand.vmem [shape: f32[1,128], index: 7, kind: input, shape index: {}]   ;;  %s3029_s8 = inlined_call_operand.vmem [shape: f32[8,128], index: 8, kind: output, shape index: {}]  }
   0x1   :  { %v1856_v0 = vld [vmem:[%s3021_s1 + $0x4] ss:$16 sps:$4 sm:$0xff]   ;;  %155 = vmatprep.mubr.bf16.mxu0 %v3030_v1  ;;  %228 = vmatprep.mubr.bf16.mxu1 %v3030_v1  ;;  %v1858_v2 = vld [vmem:[%s3021_s1 + $0xc] ss:$16 sps:$4 sm:$0xff]   ;;  %v1860_v3 = vld [vmem:[%s3021_s1] ss:$16 sps:$4 sm:$0xff]  }
   0x2   :  { %137 = vmatprep.subr.bf16.mxu0 %v1856_v0  ;;  %v1861_v4 = vld [vmem:[%s3021_s1 + $0x8] ss:$16 sps:$4 sm:$0xff]   ;;  %210 = vmatprep.subr.bf16.mxu1 %v1858_v2  ;;  %v1862_v5 = vld [vmem:[%s3022_s0] sm:$0xff]   ;;  %v2152_v7 = vld [vmem:[%s3023_s2 + $0xec] ss:$16 sps:$4 sm:$0xff]   ;;  %v51_v43 = vshrl.u32 %v50_v42, 7 }
   0x3   :  { %138 = vmatpush1.bf16.msra.mxu0 %v1860_v3  ;;  %211 = vmatpush1.bf16.msra.mxu1 %v1861_v4  ;;  %v2147_v6 = vld [vmem:[%s3023_s2 + $0xe4] ss:$16 sps:$4 sm:$0xff]   ;;  %v2157_v8 = vld [vmem:[%s3023_s2 + $0xe0] ss:$16 sps:$4 sm:$0xff]   ;;  %v2163_v9 = vld [vmem:[%s3023_s2 + $0xe8] ss:$16 sps:$4 sm:$0xff]  }
   0x4   :  { %504 = vmatprep.subr.bf16.mxu0 %v2147_v6  ;;  %v2170_v10 = vld [vmem:[%s3023_s2 + $0xc4] ss:$16 sps:$4 sm:$0xff]   ;;  %545 = vmatprep.subr.bf16.mxu1 %v2152_v7  ;;  %v2177_v11 = vld [vmem:[%s3023_s2 + $0xcc] ss:$16 sps:$4 sm:$0xff]   ;;  %v2182_v12 = vld [vmem:[%s3023_s2 + $0xc0] ss:$16 sps:$4 sm:$0xff]  }
   0x5   :  { %v2187_v13 = vld [vmem:[%s3023_s2 + $0xc8] ss:$16 sps:$4 sm:$0xff]   ;;  %v2199_v15 = vld [vmem:[%s3023_s2 + $0xa4] ss:$16 sps:$4 sm:$0xff]   ;;  %v2205_v16 = vld [vmem:[%s3023_s2 + $0xac] ss:$16 sps:$4 sm:$0xff]  }
   0x6   :  { %1681 = vmatmul.mubr.msk.bf16.vlgmr.msra.gmra.mxu0 %vm110_vm0, %v1862_v5  ;;  %1685 = vmatmul.mubr.msk.bf16.vlgmr.msra.gmra.mxu1 %vm110_vm0, %v1862_v5  ;;  %v1875_v14 = vld [vmem:[%s3022_s0 + $0x8] sm:$0xff]   ;;  %v2211_v17 = vld [vmem:[%s3023_s2 + $0xa0] ss:$16 sps:$4 sm:$0xff]   ;;  %v2223_v19 = vld [vmem:[%s3023_s2 + $0x84] ss:$16 sps:$4 sm:$0xff]   ;;  %v60_v44 = vsub.s32 2, %v51_v43 }
   0x7   :  { %505 = vmatpush1.bf16.msra.mxu0 %v2157_v8  ;;  %546 = vmatpush1.bf16.msra.mxu1 %v2163_v9  ;;  %v2216_v18 = vld [vmem:[%s3023_s2 + $0xa8] ss:$16 sps:$4 sm:$0xff]   ;;  %v2229_v20 = vld [vmem:[%s3023_s2 + $0x8c] ss:$16 sps:$4 sm:$0xff]   ;;  %v2236_v21 = vld [vmem:[%s3023_s2 + $0x80] ss:$16 sps:$4 sm:$0xff]  }
   0x8   :  { %506 = vmatprep.subr.bf16.mxu0 %v2170_v10  ;;  %547 = vmatprep.subr.bf16.mxu1 %v2177_v11  ;;  %v2242_v22 = vld [vmem:[%s3023_s2 + $0x88] ss:$16 sps:$4 sm:$0xff]   ;;  %v2250_v23 = vld [vmem:[%s3023_s2 + $0x64] ss:$16 sps:$4 sm:$0xff]   ;;  %v2257_v24 = vld [vmem:[%s3023_s2 + $0x6c] ss:$16 sps:$4 sm:$0xff]  }
   0x9   :  { %165 = vmatprep.mubr.bf16.mxu0 %v3030_v1  ;;  %238 = vmatprep.mubr.bf16.mxu1 %v3030_v1  ;;  %v1888_v25 = vld [vmem:[%s3022_s0 + $0x10] sm:$0xff]   ;;  %v2273_v27 = vld [vmem:[%s3023_s2 + $0x68] ss:$16 sps:$4 sm:$0xff]   ;;  %v2284_v29 = vld [vmem:[%s3023_s2 + $0x4c] ss:$16 sps:$4 sm:$0xff]   ;;  %v52_v45 = vsub.s32 0, %v51_v43 }
   0xa   :  { %v2266_v26 = vld [vmem:[%s3023_s2 + $0x60] ss:$16 sps:$4 sm:$0xff]   ;;  %v2278_v28 = vld [vmem:[%s3023_s2 + $0x44] ss:$16 sps:$4 sm:$0xff]   ;;  %v2297_v31 = vld [vmem:[%s3023_s2 + $0x48] ss:$16 sps:$4 sm:$0xff]  }
   0xb   :  { %507 = vmatpush1.bf16.msra.mxu0 %v2182_v12  ;;  %548 = vmatpush1.bf16.msra.mxu1 %v2187_v13  ;;  %v2292_v30 = vld [vmem:[%s3023_s2 + $0x40] ss:$16 sps:$4 sm:$0xff]   ;;  %v2305_v32 = vld [vmem:[%s3023_s2 + $0x24] ss:$16 sps:$4 sm:$0xff]   ;;  %v2312_v33 = vld [vmem:[%s3023_s2 + $0x2c] ss:$16 sps:$4 sm:$0xff]  }
   0xc   :  { %508 = vmatprep.subr.bf16.mxu0 %v2199_v15  ;;  %549 = vmatprep.subr.bf16.mxu1 %v2205_v16  ;;  %v1901_v34 = vld [vmem:[%s3022_s0 + $0x18] sm:$0xff]   ;;  %v2321_v35 = vld [vmem:[%s3023_s2 + $0x20] ss:$16 sps:$4 sm:$0xff]   ;;  %v2333_v37 = vld [vmem:[%s3023_s2 + $0x4] ss:$16 sps:$4 sm:$0xff]   ;;  %v64_v46 = vsub.s32 3, %v51_v43 }
   0xd   :  { %v2328_v36 = vld [vmem:[%s3023_s2 + $0x28] ss:$16 sps:$4 sm:$0xff]   ;;  %v2339_v38 = vld [vmem:[%s3023_s2 + $0xc] ss:$16 sps:$4 sm:$0xff]   ;;  %v2347_v39 = vld [vmem:[%s3023_s2] ss:$16 sps:$4 sm:$0xff]  }
   0xe   :  { %1682 = vmatmul.mubr.msk.bf16.gmra.mxu0 %vm110_vm0, %v1875_v14  ;;  %1686 = vmatmul.mubr.msk.bf16.gmra.mxu1 %vm110_vm0, %v1875_v14  ;;  %v2355_v40 = vld [vmem:[%s3023_s2 + $0x8] ss:$16 sps:$4 sm:$0xff]   ;;  %v48_v47 = vld [vmem:[%s3024_s3] sm:$0xf]  ;;  %v56_v51 = vsub.s32 1, %v51_v43  ;;  %vm2081_vm1 = vmmov 0  }
   0xf   :  { %509 = vmatpush1.bf16.msra.mxu0 %v2211_v17  ;;  %175 = vmatprep.mubr.bf16.mxu0 %v3030_v1  ;;  %v2404_v50 = vrot.slane %v48_v47, %v60_v44  ;;  %v53_v54 = vrot.slane %v48_v47, %v52_v45  ;;  %v2410_v55 = vrot.slane %v48_v47, %v64_v46 }
  0x10   :  { %550 = vmatpush1.bf16.msra.mxu1 %v2216_v18  ;;  %510 = vmatprep.subr.bf16.mxu0 %v2223_v19  ;;  %v57_v58 = vrot.slane %v48_v47, %v56_v51 }
  0x11   :  { %551 = vmatprep.subr.bf16.mxu1 %v2229_v20  ;;  %248 = vmatprep.mubr.bf16.mxu1 %v3030_v1 }
  0x13   :  { %511 = vmatpush1.bf16.msra.mxu0 %v2236_v21 }
  0x14   :  { %552 = vmatpush1.bf16.msra.mxu1 %v2242_v22  ;;  %512 = vmatprep.subr.bf16.mxu0 %v2250_v23 }
  0x15   :  { %553 = vmatprep.subr.bf16.mxu1 %v2257_v24 }
  0x16   :  { %1683 = vmatmul.mubr.msk.bf16.gmra.mxu0 %vm110_vm0, %v1888_v25  ;;  %1687 = vmatmul.mubr.msk.bf16.gmra.mxu1 %vm110_vm0, %v1888_v25 }
  0x17   :  { %513 = vmatpush1.bf16.msra.mxu0 %v2266_v26  ;;  %185 = vmatprep.mubr.bf16.mxu0 %v3030_v1 }
  0x18   :  { %554 = vmatpush1.bf16.msra.mxu1 %v2273_v27  ;;  %514 = vmatprep.subr.bf16.mxu0 %v2278_v28 }
  0x19   :  { %555 = vmatprep.subr.bf16.mxu1 %v2284_v29  ;;  %258 = vmatprep.mubr.bf16.mxu1 %v3030_v1 }
  0x1b   :  { %515 = vmatpush1.bf16.msra.mxu0 %v2292_v30 }
  0x1c   :  { %556 = vmatpush1.bf16.msra.mxu1 %v2297_v31  ;;  %516 = vmatprep.subr.bf16.mxu0 %v2305_v32 }
  0x1d   :  { %557 = vmatprep.subr.bf16.mxu1 %v2312_v33 }
  0x1e   :  { %1684 = vmatmul.mubr.msk.bf16.gmra.mxu0 %vm110_vm0, %v1901_v34  ;;  %1688 = vmatmul.mubr.msk.bf16.gmra.mxu1 %vm110_vm0, %v1901_v34 }
  0x1f   :  { %517 = vmatpush1.bf16.msra.mxu0 %v2321_v35  ;;  %536 = vmatprep.mubr.bf16.mxu0 %v3030_v1 }
  0x20   :  { %558 = vmatpush1.bf16.msra.mxu1 %v2328_v36  ;;  %518 = vmatprep.subr.bf16.mxu0 %v2333_v37 }
  0x21   :  { %559 = vmatprep.subr.bf16.mxu1 %v2339_v38  ;;  %577 = vmatprep.mubr.bf16.mxu1 %v3030_v1 }
  0x23   :  { %519 = vmatpush1.bf16.msra.mxu0 %v2347_v39 }
  0x24   :  { %560 = vmatpush1.bf16.msra.mxu1 %v2355_v40  ;;  %624 = vmatprep.subr.bf16.mxu0 %v2147_v6 }
  0x25   :  { %665 = vmatprep.subr.bf16.mxu1 %v2152_v7 }
  0x26   :  { %537 = vmatmul.mubr.bf16.vlgmr.msra.gmra.mxu0 %v2079_v41 }
  0x27   :  { %578 = vmatmul.mubr.bf16.vlgmr.msra.gmra.mxu1 %v2079_v41  ;;  %625 = vmatpush1.bf16.msra.mxu0 %v2157_v8 }
  0x28   :  { %666 = vmatpush1.bf16.msra.mxu1 %v2163_v9  ;;  %626 = vmatprep.subr.bf16.mxu0 %v2170_v10 }
  0x29   :  { %667 = vmatprep.subr.bf16.mxu1 %v2177_v11  ;;  %656 = vmatprep.mubr.bf16.mxu0 %v3030_v1 }
  0x2a   :  { %697 = vmatprep.mubr.bf16.mxu1 %v3030_v1 }
  0x2b   :  { %627 = vmatpush1.bf16.msra.mxu0 %v2182_v12 }
  0x2c   :  { %668 = vmatpush1.bf16.msra.mxu1 %v2187_v13  ;;  %628 = vmatprep.subr.bf16.mxu0 %v2199_v15 }
  0x2d   :  { %669 = vmatprep.subr.bf16.mxu1 %v2205_v16 }
  0x2f   :  { %629 = vmatpush1.bf16.msra.mxu0 %v2211_v17 }
  0x30   :  { %670 = vmatpush1.bf16.msra.mxu1 %v2216_v18  ;;  %630 = vmatprep.subr.bf16.mxu0 %v2223_v19 }
  0x31   :  { %671 = vmatprep.subr.bf16.mxu1 %v2229_v20 }
  0x33   :  { %631 = vmatpush1.bf16.msra.mxu0 %v2236_v21 }
  0x34   :  { %672 = vmatpush1.bf16.msra.mxu1 %v2242_v22  ;;  %632 = vmatprep.subr.bf16.mxu0 %v2250_v23 }
  0x35   :  { %673 = vmatprep.subr.bf16.mxu1 %v2257_v24 }
  0x37   :  { %633 = vmatpush1.bf16.msra.mxu0 %v2266_v26 }
  0x38   :  { %674 = vmatpush1.bf16.msra.mxu1 %v2273_v27  ;;  %634 = vmatprep.subr.bf16.mxu0 %v2278_v28 }
  0x39   :  { %675 = vmatprep.subr.bf16.mxu1 %v2284_v29 }
  0x3b   :  { %635 = vmatpush1.bf16.msra.mxu0 %v2292_v30 }
  0x3c   :  { %676 = vmatpush1.bf16.msra.mxu1 %v2297_v31  ;;  %636 = vmatprep.subr.bf16.mxu0 %v2305_v32 }
  0x3d   :  { %677 = vmatprep.subr.bf16.mxu1 %v2312_v33 }
  0x3f   :  { %637 = vmatpush1.bf16.msra.mxu0 %v2321_v35 }
  0x40   :  { %678 = vmatpush1.bf16.msra.mxu1 %v2328_v36  ;;  %638 = vmatprep.subr.bf16.mxu0 %v2333_v37 }
  0x41   :  { %679 = vmatprep.subr.bf16.mxu1 %v2339_v38 }
  0x43   :  { %639 = vmatpush1.bf16.msra.mxu0 %v2347_v39 }
  0x44   :  { %680 = vmatpush1.bf16.msra.mxu1 %v2355_v40  ;;  %745 = vmatprep.subr.bf16.mxu0 %v2147_v6 }
  0x45   :  { %786 = vmatprep.subr.bf16.mxu1 %v2152_v7 }
  0xc6   :  { %v2400_v48 = vpop.f32.mrf.mxu0  ;;  %v2402_v49 = vpop.f32.mrf.mxu1 }
  0xc8   :  { %v2406_v52 = vpop.f32.mrf.mxu0  ;;  %v2408_v53 = vpop.f32.mrf.mxu1 }
  0xca   :  { %v161_v56 = vpop.f32.mrf.mxu0  ;;  %v234_v57 = vpop.f32.mrf.mxu1 }
  0xcb   :  { %v2412_v59 = vadd.f32 %v161_v56, %v53_v54  ;;  %v2415_v60 = vadd.f32 %v234_v57, %v2404_v50 }
  0xcc   :  { %v163_v61 = vpop.f32.mrf.mxu0  ;;  %v236_v62 = vpop.f32.mrf.mxu1 }
  0xcd   :  { %v2417_v63 = vadd.f32 %v163_v61, %v57_v58  ;;  %v2420_v0 = vadd.f32 %v236_v62, %v2410_v55 }
  0xce   :  { %v167_v2 = vpop.f32.mrf.mxu0  ;;  %v240_v3 = vpop.f32.mrf.mxu1 }
  0xcf   :  { %v2422_v4 = vadd.f32 %v167_v2, %v53_v54  ;;  %v2425_v5 = vadd.f32 %v240_v3, %v2404_v50 }
  0xd0   :  { %v169_v14 = vpop.f32.mrf.mxu0  ;;  %v242_v25 = vpop.f32.mrf.mxu1 }
  0xd1   :  { %3032 = vst [vmem:[#allocation5_spill] sm:$0xff] %v2425_v5  ;;  %v2427_v34 = vadd.f32 %v169_v14, %v57_v58  ;;  %v2430_v41 = vadd.f32 %v242_v25, %v2410_v55 }
  0xd2   :  { %v171_v42 = vpop.f32.mrf.mxu0  ;;  %v244_v43 = vpop.f32.mrf.mxu1 }
  0xd3   :  { %v2432_v44 = vadd.f32 %v171_v42, %v53_v54  ;;  %v2435_v45 = vadd.f32 %v244_v43, %v2404_v50 }
  0xd4   :  { %v173_v46 = vpop.f32.mrf.mxu0  ;;  %v246_v47 = vpop.f32.mrf.mxu1 }
  0xd5   :  { %3033 = vst [vmem:[#allocation6_spill] sm:$0xff] %v2432_v44  ;;  %3034 = vst [vmem:[#allocation7_spill] sm:$0xff] %v2435_v45  ;;  %v2437_v51 = vadd.f32 %v173_v46, %v57_v58  ;;  %v2440_v56 = vadd.f32 %v246_v47, %v2410_v55 }
  0xd6   :  { %v177_v57 = vpop.f32.mrf.mxu0  ;;  %v250_v61 = vpop.f32.mrf.mxu1 }
  0xd7   :  { %3035 = vst [vmem:[#allocation8_spill] sm:$0xff] %v2437_v51  ;;  %3036 = vst [vmem:[#allocation9_spill] sm:$0xff] %v2440_v56  ;;  %v2442_v62 = vadd.f32 %v177_v57, %v53_v54  ;;  %v2445_v2 = vadd.f32 %v250_v61, %v2404_v50 }
  0xd8   :  { %v179_v3 = vpop.f32.mrf.mxu0  ;;  %v252_v14 = vpop.f32.mrf.mxu1 }
  0xd9   :  { %3037 = vst [vmem:[#allocation10_spill] sm:$0xff] %v2442_v62  ;;  %3038 = vst [vmem:[#allocation11_spill] sm:$0xff] %v2445_v2  ;;  %v2447_v25 = vadd.f32 %v179_v3, %v57_v58  ;;  %v2450_v42 = vadd.f32 %v252_v14, %v2410_v55 }
  0xda   :  { %v181_v43 = vpop.f32.mrf.mxu0  ;;  %v254_v46 = vpop.f32.mrf.mxu1 }
  0xdb   :  { %3039 = vst [vmem:[#allocation12_spill] sm:$0xff] %v2447_v25  ;;  %3040 = vst [vmem:[#allocation13_spill] sm:$0xff] %v2450_v42  ;;  %v2452_v1 = vadd.f32 %v181_v43, %v53_v54  ;;  %v2455_v47 = vadd.f32 %v254_v46, %v2404_v50 }
  0xdc   :  { %v183_v45 = vpop.f32.mrf.mxu0  ;;  %v256_v57 = vpop.f32.mrf.mxu1 }
  0xdd   :  { %3041 = vst [vmem:[#allocation14_spill] sm:$0xff] %v2452_v1  ;;  %3042 = vst [vmem:[#allocation15_spill] sm:$0xff] %v2455_v47  ;;  %v2457_v62 = vadd.f32 %v183_v45, %v57_v58  ;;  %v2460_v61 = vadd.f32 %v256_v57, %v2410_v55 }
  0xde   :  { %v187_v2 = vpop.f32.mrf.mxu0  ;;  %v260_v3 = vpop.f32.mrf.mxu1 }
  0xdf   :  { %3043 = vst [vmem:[#allocation16_spill] sm:$0xff] %v2457_v62  ;;  %3044 = vst [vmem:[#allocation17_spill] sm:$0xff] %v2460_v61  ;;  %v2462_v25 = vadd.f32 %v187_v2, %v53_v54  ;;  %v2465_v14 = vadd.f32 %v260_v3, %v2404_v50 }
  0xe0   :  { %v189_v42 = vpop.f32.mrf.mxu0  ;;  %v262_v43 = vpop.f32.mrf.mxu1 }
  0xe1   :  { %3045 = vst [vmem:[#allocation18_spill] sm:$0xff] %v2462_v25  ;;  %3046 = vst [vmem:[#allocation19_spill] sm:$0xff] %v2465_v14  ;;  %v2467_v1 = vadd.f32 %v189_v42, %v57_v58  ;;  %v2470_v46 = vadd.f32 %v262_v43, %v2410_v55  ;;  %v158_v25 = vadd.f32 %v2400_v48, %v53_v54 }
  0xe2   :  { %v191_v47 = vpop.f32.mrf.mxu0  ;;  %v264_v45 = vpop.f32.mrf.mxu1  ;;  %v160_v43 = vadd.f32 %v2406_v52, %v57_v58  ;;  %v231_v52 = vadd.f32 %v2402_v49, %v2404_v50 }
  0xe3   :  { %3047 = vst [vmem:[#allocation20_spill] sm:$0xff] %v2467_v1  ;;  %3048 = vst [vmem:[#allocation21_spill] sm:$0xff] %v2470_v46  ;;  %v2472_v62 = vadd.f32 %v191_v47, %v53_v54  ;;  %v2475_v57 = vadd.f32 %v264_v45, %v2404_v50  ;;  %v233_v54 = vadd.f32 %v2408_v53, %v2410_v55 }
  0xe4   :  { %v193_v61 = vpop.f32.mrf.mxu0  ;;  %v266_v2 = vpop.f32.mrf.mxu1 }
  0xe5   :  { %3049 = vst [vmem:[#allocation22_spill] sm:$0xff] %v2472_v62  ;;  %3050 = vst [vmem:[#allocation23_spill] sm:$0xff] %v2475_v57  ;;  %v2478_v3 = vadd.f32 %v193_v61, %v57_v58  ;;  %v2481_v14 = vadd.f32 %v266_v2, %v2410_v55 }
  0xe6   :  { %v538_v42 = vpop.f32.mrf.mxu0 }
  0xe7   :  { %v539_v46 = vadd.f32 %v538_v42, %v158_v25  ;;  %v579_v1 = vpop.f32.mrf.mxu1 }
  0xe8   :  { %v540_v56 = vpop.f32.mrf.mxu0  ;;  %v580_v2 = vadd.f32 %v579_v1, %v231_v52 }
  0xe9   :  { %v1721_v47 = vmul.f32 -1.442695, %v539_v46  ;;  %v541_v62 = vadd.f32 %v540_v56, %v160_v43  ;;  %v581_v51 = vpop.f32.mrf.mxu1 }
  0xea   :  { %v542_v45 = vpop.f32.mrf.mxu0  ;;  %v582_v61 = vadd.f32 %v581_v51, %v233_v54 }
  0xeb   :  { %1914 = vpow2.f32 %v1721_v47  ;;  %v1722_v57 = vmul.f32 -1.442695, %v541_v62  ;;  %v583_v44 = vpop.f32.mrf.mxu1  ;;  %v3051_v45 = vmov 0  }
  0xec   :  { %v543_v5 = vpop.f32.mrf.mxu0  ;;  %v1723_v58 = vmul.f32 -1.442695, %v582_v61 }
  0xed   :  { %1916 = vpow2.f32 %v1722_v57  ;;  %v584_v48 = vpop.f32.mrf.mxu1 }
  0xee   :  { %1918 = vpow2.f32 %v1723_v58 }
  0xf8   :  { %v1915_v25 = vpop.eup %1914 }
  0xf9   :  { %v589_v46 = vadd.f32 1.0, %v1915_v25 }
  0xfa   :  { %v1917_v56 = vpop.eup %1916 }
  0xfb   :  { %1920 = vrcp.f32 %v589_v46  ;;  %v595_v42 = vadd.f32 1.0, %v1917_v56  ;;  %v1919_v5 = vpop.eup %1918 }
  0xfc   :  { %1922 = vtanh.f32 %v580_v2  ;;  %v602_v43 = vadd.f32 1.0, %v1919_v5 }
  0xfd   :  { %1924 = vrcp.f32 %v595_v42 }
  0xfe   :  { %1926 = vrcp.f32 %v602_v43 }
 0x108   :  { %v1921_v44 = vpop.eup %1920 }
 0x109   :  { %v1923_v62 = vpop.eup %1922 }
 0x10a   :  { %v1925_v57 = vpop.eup %1924  ;;  %v606_v55 = vmul.f32 %v1923_v62, %v1921_v44 }
 0x10b   :  { %v605_v53 = vmul.f32 0.0, %v1925_v57  ;;  %v1927_v1 = vpop.eup %1926 }
 0x10d   :  { %v2488_v51 = vadd.f32 %v606_v55, %v605_v53 }
 0x10f   :  { %1928 = vtanh.f32 %v2488_v51 }
 0x11c   :  { %v1929_v49 = vpop.eup %1928 }
 0x11d   :  { %v609_v50 = vmul.f32 %v1929_v49, %v1927_v1 }
 0x11f   :  { %v616_v47 = vpack.c.bf16 %v609_v50, %v609_v50 }
 0x121   :  { %657 = vmatmul.mubr.bf16.vlgmr.msra.gmra.mxu0 %v616_v47  ;;  %698 = vmatmul.mubr.bf16.vlgmr.msra.gmra.mxu1 %v616_v47 }
 0x122   :  { %746 = vmatpush1.bf16.msra.mxu0 %v2157_v8  ;;  %787 = vmatpush1.bf16.msra.mxu1 %v2163_v9 }
 0x123   :  { %747 = vmatprep.subr.bf16.mxu0 %v2170_v10  ;;  %788 = vmatprep.subr.bf16.mxu1 %v2177_v11 }
 0x124   :  { %777 = vmatprep.mubr.bf16.mxu0 %v3051_v45  ;;  %818 = vmatprep.mubr.bf16.mxu1 %v3051_v45 }
 0x126   :  { %748 = vmatpush1.bf16.msra.mxu0 %v2182_v12  ;;  %789 = vmatpush1.bf16.msra.mxu1 %v2187_v13 }
 0x127   :  { %749 = vmatprep.subr.bf16.mxu0 %v2199_v15  ;;  %790 = vmatprep.subr.bf16.mxu1 %v2205_v16 }
 0x12a   :  { %750 = vmatpush1.bf16.msra.mxu0 %v2211_v17  ;;  %791 = vmatpush1.bf16.msra.mxu1 %v2216_v18 }
 0x12b   :  { %751 = vmatprep.subr.bf16.mxu0 %v2223_v19  ;;  %792 = vmatprep.subr.bf16.mxu1 %v2229_v20 }
 0x12e   :  { %752 = vmatpush1.bf16.msra.mxu0 %v2236_v21  ;;  %793 = vmatpush1.bf16.msra.mxu1 %v2242_v22 }
 0x12f   :  { %753 = vmatprep.subr.bf16.mxu0 %v2250_v23  ;;  %794 = vmatprep.subr.bf16.mxu1 %v2257_v24 }
 0x132   :  { %754 = vmatpush1.bf16.msra.mxu0 %v2266_v26  ;;  %795 = vmatpush1.bf16.msra.mxu1 %v2273_v27 }
 0x133   :  { %755 = vmatprep.subr.bf16.mxu0 %v2278_v28  ;;  %796 = vmatprep.subr.bf16.mxu1 %v2284_v29 }
 0x136   :  { %756 = vmatpush1.bf16.msra.mxu0 %v2292_v30  ;;  %797 = vmatpush1.bf16.msra.mxu1 %v2297_v31 }
 0x137   :  { %757 = vmatprep.subr.bf16.mxu0 %v2305_v32  ;;  %798 = vmatprep.subr.bf16.mxu1 %v2312_v33 }
 0x13a   :  { %758 = vmatpush1.bf16.msra.mxu0 %v2321_v35  ;;  %799 = vmatpush1.bf16.msra.mxu1 %v2328_v36 }
 0x13b   :  { %759 = vmatprep.subr.bf16.mxu0 %v2333_v37  ;;  %800 = vmatprep.subr.bf16.mxu1 %v2339_v38 }
 0x13e   :  { %760 = vmatpush1.bf16.msra.mxu0 %v2347_v39  ;;  %801 = vmatpush1.bf16.msra.mxu1 %v2355_v40 }
 0x13f   :  { %866 = vmatprep.subr.bf16.mxu0 %v2147_v6  ;;  %907 = vmatprep.subr.bf16.mxu1 %v2152_v7 }
 0x1e1   :  { %v658_v48 = vpop.f32.mrf.mxu0  ;;  %v699_v54 = vpop.f32.mrf.mxu1 }
 0x1e2   :  { %v659_v61 = vadd.f32 %v658_v48, %v2412_v59  ;;  %v700_v57 = vadd.f32 %v699_v54, %v2415_v60 }
 0x1e3   :  { %v660_v52 = vpop.f32.mrf.mxu0  ;;  %v701_v58 = vpop.f32.mrf.mxu1 }
 0x1e4   :  { %v1724_v25 = vmul.f32 -1.442695, %v659_v61  ;;  %v661_v2 = vadd.f32 %v660_v52, %v2417_v63  ;;  %v702_v62 = vadd.f32 %v701_v58, %v2420_v0 }
 0x1e5   :  { %v662_v46 = vpop.f32.mrf.mxu0  ;;  %v703_v56 = vpop.f32.mrf.mxu1 }
 0x1e6   :  { %1930 = vpow2.f32 %v1724_v25  ;;  %v1725_v42 = vmul.f32 -1.442695, %v661_v2  ;;  %v1726_v43 = vmul.f32 -1.442695, %v702_v62 }
 0x1e7   :  { %v663_v5 = vpop.f32.mrf.mxu0  ;;  %v704_v44 = vpop.f32.mrf.mxu1 }
 0x1e8   :  { %1932 = vpow2.f32 %v1725_v42 }
 0x1e9   :  { %1934 = vtanh.f32 %v700_v57 }
 0x1ea   :  { %1936 = vpow2.f32 %v1726_v43 }
 0x1f3   :  { %v1931_v53 = vpop.eup %1930 }
 0x1f4   :  { %v709_v55 = vadd.f32 1.0, %v1931_v53 }
 0x1f5   :  { %v1933_v59 = vpop.eup %1932 }
 0x1f6   :  { %1938 = vrcp.f32 %v709_v55  ;;  %v715_v1 = vadd.f32 1.0, %v1933_v59  ;;  %v1935_v63 = vpop.eup %1934 }
 0x1f7   :  { %v1937_v49 = vpop.eup %1936 }
 0x1f8   :  { %1940 = vrcp.f32 %v715_v1  ;;  %v722_v61 = vadd.f32 1.0, %v1937_v49  ;;  %v3052_v1 = vld [vmem:[#allocation5_spill] sm:$0xff] }
 0x1fa   :  { %1942 = vrcp.f32 %v722_v61 }
 0x203   :  { %v1939_v50 = vpop.eup %1938 }
 0x204   :  { %v726_v47 = vmul.f32 %v1939_v50, %v1935_v63 }
 0x205   :  { %v1941_v48 = vpop.eup %1940 }
 0x206   :  { %v725_v52 = vmul.f32 %v1941_v48, %v2488_v51 }
 0x207   :  { %v1943_v60 = vpop.eup %1942 }
 0x208   :  { %v2530_v0 = vadd.f32 %v726_v47, %v725_v52 }
 0x20a   :  { %1944 = vtanh.f32 %v2530_v0 }
 0x217   :  { %v1945_v54 = vpop.eup %1944 }
 0x218   :  { %v729_v58 = vmul.f32 %v1945_v54, %v1943_v60 }
 0x21a   :  { %v737_v25 = vpack.c.bf16 %v729_v58, %v729_v58 }
 0x21c   :  { %778 = vmatmul.mubr.bf16.vlgmr.msra.gmra.mxu0 %v737_v25  ;;  %819 = vmatmul.mubr.bf16.vlgmr.msra.gmra.mxu1 %v737_v25 }
 0x21d   :  { %867 = vmatpush1.bf16.msra.mxu0 %v2157_v8  ;;  %908 = vmatpush1.bf16.msra.mxu1 %v2163_v9 }
 0x21e   :  { %868 = vmatprep.subr.bf16.mxu0 %v2170_v10  ;;  %909 = vmatprep.subr.bf16.mxu1 %v2177_v11 }
 0x21f   :  { %898 = vmatprep.mubr.bf16.mxu0 %v3051_v45  ;;  %939 = vmatprep.mubr.bf16.mxu1 %v3051_v45 }
 0x221   :  { %869 = vmatpush1.bf16.msra.mxu0 %v2182_v12  ;;  %910 = vmatpush1.bf16.msra.mxu1 %v2187_v13 }
 0x222   :  { %870 = vmatprep.subr.bf16.mxu0 %v2199_v15  ;;  %911 = vmatprep.subr.bf16.mxu1 %v2205_v16 }
 0x225   :  { %871 = vmatpush1.bf16.msra.mxu0 %v2211_v17  ;;  %912 = vmatpush1.bf16.msra.mxu1 %v2216_v18 }
 0x226   :  { %872 = vmatprep.subr.bf16.mxu0 %v2223_v19  ;;  %913 = vmatprep.subr.bf16.mxu1 %v2229_v20 }
 0x229   :  { %873 = vmatpush1.bf16.msra.mxu0 %v2236_v21  ;;  %914 = vmatpush1.bf16.msra.mxu1 %v2242_v22 }
 0x22a   :  { %874 = vmatprep.subr.bf16.mxu0 %v2250_v23  ;;  %915 = vmatprep.subr.bf16.mxu1 %v2257_v24 }
 0x22d   :  { %875 = vmatpush1.bf16.msra.mxu0 %v2266_v26  ;;  %916 = vmatpush1.bf16.msra.mxu1 %v2273_v27 }
 0x22e   :  { %876 = vmatprep.subr.bf16.mxu0 %v2278_v28  ;;  %917 = vmatprep.subr.bf16.mxu1 %v2284_v29 }
 0x231   :  { %877 = vmatpush1.bf16.msra.mxu0 %v2292_v30  ;;  %918 = vmatpush1.bf16.msra.mxu1 %v2297_v31 }
 0x232   :  { %878 = vmatprep.subr.bf16.mxu0 %v2305_v32  ;;  %919 = vmatprep.subr.bf16.mxu1 %v2312_v33 }
 0x235   :  { %879 = vmatpush1.bf16.msra.mxu0 %v2321_v35  ;;  %920 = vmatpush1.bf16.msra.mxu1 %v2328_v36 }
 0x236   :  { %880 = vmatprep.subr.bf16.mxu0 %v2333_v37  ;;  %921 = vmatprep.subr.bf16.mxu1 %v2339_v38 }
 0x239   :  { %881 = vmatpush1.bf16.msra.mxu0 %v2347_v39  ;;  %922 = vmatpush1.bf16.msra.mxu1 %v2355_v40 }
 0x23a   :  { %987 = vmatprep.subr.bf16.mxu0 %v2147_v6  ;;  %1028 = vmatprep.subr.bf16.mxu1 %v2152_v7 }
 0x2dc   :  { %v779_v51 = vpop.f32.mrf.mxu0  ;;  %v820_v2 = vpop.f32.mrf.mxu1 }
 0x2dd   :  { %v780_v46 = vadd.f32 %v779_v51, %v2422_v4  ;;  %v821_v63 = vadd.f32 %v820_v2, %v3052_v1 }
 0x2de   :  { %v781_v56 = vpop.f32.mrf.mxu0  ;;  %v822_v42 = vpop.f32.mrf.mxu1 }
 0x2df   :  { %v1727_v5 = vmul.f32 -1.442695, %v780_v46  ;;  %v782_v44 = vadd.f32 %v781_v56, %v2427_v34  ;;  %v823_v59 = vadd.f32 %v822_v42, %v2430_v41 }
 0x2e0   :  { %v783_v62 = vpop.f32.mrf.mxu0  ;;  %v824_v57 = vpop.f32.mrf.mxu1 }
 0x2e1   :  { %1946 = vpow2.f32 %v1727_v5  ;;  %v1728_v43 = vmul.f32 -1.442695, %v782_v44  ;;  %v1729_v49 = vmul.f32 -1.442695, %v823_v59  ;;  %v3053_v5 = vld [vmem:[#allocation6_spill] sm:$0xff] }
 0x2e2   :  { %v784_v53 = vpop.f32.mrf.mxu0  ;;  %v825_v55 = vpop.f32.mrf.mxu1 }
 0x2e3   :  { %1948 = vpow2.f32 %v1728_v43  ;;  %v3054_v53 = vld [vmem:[#allocation8_spill] sm:$0xff] }
 0x2e4   :  { %1950 = vtanh.f32 %v821_v63 }
 0x2e5   :  { %1952 = vpow2.f32 %v1729_v49 }
 0x2ee   :  { %v1947_v50 = vpop.eup %1946 }
 0x2ef   :  { %v830_v47 = vadd.f32 1.0, %v1947_v50 }
 0x2f0   :  { %v1949_v4 = vpop.eup %1948 }
 0x2f1   :  { %1954 = vrcp.f32 %v830_v47  ;;  %v836_v48 = vadd.f32 1.0, %v1949_v4  ;;  %v1951_v34 = vpop.eup %1950  ;;  %v3055_v47 = vld [vmem:[#allocation9_spill] sm:$0xff]  ;;  %v3056_v4 = vld [vmem:[#allocation7_spill] sm:$0xff] }
 0x2f2   :  { %v1953_v61 = vpop.eup %1952 }
 0x2f3   :  { %1956 = vrcp.f32 %v836_v48  ;;  %v843_v58 = vadd.f32 1.0, %v1953_v61 }
 0x2f5   :  { %1958 = vrcp.f32 %v843_v58 }
 0x2fe   :  { %v1955_v52 = vpop.eup %1954 }
 0x2ff   :  { %v847_v60 = vmul.f32 %v1955_v52, %v1951_v34 }
 0x300   :  { %v1957_v54 = vpop.eup %1956 }
 0x301   :  { %v846_v25 = vmul.f32 %v1957_v54, %v2530_v0 }
 0x302   :  { %v1959_v51 = vpop.eup %1958 }
 0x303   :  { %v2572_v41 = vadd.f32 %v847_v60, %v846_v25 }
 0x305   :  { %1960 = vtanh.f32 %v2572_v41 }
 0x312   :  { %v1961_v2 = vpop.eup %1960 }
 0x313   :  { %v850_v46 = vmul.f32 %v1961_v2, %v1959_v51 }
 0x315   :  { %v858_v56 = vpack.c.bf16 %v850_v46, %v850_v46 }
 0x317   :  { %899 = vmatmul.mubr.bf16.vlgmr.msra.gmra.mxu0 %v858_v56  ;;  %940 = vmatmul.mubr.bf16.vlgmr.msra.gmra.mxu1 %v858_v56 }
 0x318   :  { %988 = vmatpush1.bf16.msra.mxu0 %v2157_v8  ;;  %1029 = vmatpush1.bf16.msra.mxu1 %v2163_v9 }
 0x319   :  { %989 = vmatprep.subr.bf16.mxu0 %v2170_v10  ;;  %1030 = vmatprep.subr.bf16.mxu1 %v2177_v11 }
 0x31a   :  { %1019 = vmatprep.mubr.bf16.mxu0 %v3051_v45  ;;  %1060 = vmatprep.mubr.bf16.mxu1 %v3051_v45 }
 0x31c   :  { %990 = vmatpush1.bf16.msra.mxu0 %v2182_v12  ;;  %1031 = vmatpush1.bf16.msra.mxu1 %v2187_v13 }
 0x31d   :  { %991 = vmatprep.subr.bf16.mxu0 %v2199_v15  ;;  %1032 = vmatprep.subr.bf16.mxu1 %v2205_v16 }
 0x320   :  { %992 = vmatpush1.bf16.msra.mxu0 %v2211_v17  ;;  %1033 = vmatpush1.bf16.msra.mxu1 %v2216_v18 }
 0x321   :  { %993 = vmatprep.subr.bf16.mxu0 %v2223_v19  ;;  %1034 = vmatprep.subr.bf16.mxu1 %v2229_v20 }
 0x324   :  { %994 = vmatpush1.bf16.msra.mxu0 %v2236_v21  ;;  %1035 = vmatpush1.bf16.msra.mxu1 %v2242_v22 }
 0x325   :  { %995 = vmatprep.subr.bf16.mxu0 %v2250_v23  ;;  %1036 = vmatprep.subr.bf16.mxu1 %v2257_v24 }
 0x328   :  { %996 = vmatpush1.bf16.msra.mxu0 %v2266_v26  ;;  %1037 = vmatpush1.bf16.msra.mxu1 %v2273_v27 }
 0x329   :  { %997 = vmatprep.subr.bf16.mxu0 %v2278_v28  ;;  %1038 = vmatprep.subr.bf16.mxu1 %v2284_v29 }
 0x32c   :  { %998 = vmatpush1.bf16.msra.mxu0 %v2292_v30  ;;  %1039 = vmatpush1.bf16.msra.mxu1 %v2297_v31 }
 0x32d   :  { %999 = vmatprep.subr.bf16.mxu0 %v2305_v32  ;;  %1040 = vmatprep.subr.bf16.mxu1 %v2312_v33 }
 0x330   :  { %1000 = vmatpush1.bf16.msra.mxu0 %v2321_v35  ;;  %1041 = vmatpush1.bf16.msra.mxu1 %v2328_v36 }
 0x331   :  { %1001 = vmatprep.subr.bf16.mxu0 %v2333_v37  ;;  %1042 = vmatprep.subr.bf16.mxu1 %v2339_v38 }
 0x334   :  { %1002 = vmatpush1.bf16.msra.mxu0 %v2347_v39  ;;  %1043 = vmatpush1.bf16.msra.mxu1 %v2355_v40 }
 0x335   :  { %1108 = vmatprep.subr.bf16.mxu0 %v2147_v6  ;;  %1149 = vmatprep.subr.bf16.mxu1 %v2152_v7 }
 0x3d7   :  { %v900_v0 = vpop.f32.mrf.mxu0  ;;  %v941_v42 = vpop.f32.mrf.mxu1 }
 0x3d8   :  { %v901_v44 = vadd.f32 %v900_v0, %v3053_v5  ;;  %v942_v7 = vadd.f32 %v941_v42, %v3056_v4 }
 0x3d9   :  { %v902_v62 = vpop.f32.mrf.mxu0  ;;  %v943_v57 = vpop.f32.mrf.mxu1 }
 0x3da   :  { %v1730_v43 = vmul.f32 -1.442695, %v901_v44  ;;  %v903_v55 = vadd.f32 %v902_v62, %v3054_v53  ;;  %v944_v6 = vadd.f32 %v943_v57, %v3055_v47 }
 0x3db   :  { %v904_v59 = vpop.f32.mrf.mxu0  ;;  %v945_v1 = vpop.f32.mrf.mxu1 }
 0x3dc   :  { %1962 = vpow2.f32 %v1730_v43  ;;  %v1731_v63 = vmul.f32 -1.442695, %v903_v55  ;;  %v1732_v48 = vmul.f32 -1.442695, %v944_v6 }
 0x3dd   :  { %v905_v49 = vpop.f32.mrf.mxu0  ;;  %v946_v50 = vpop.f32.mrf.mxu1 }
 0x3de   :  { %1964 = vpow2.f32 %v1731_v63 }
 0x3df   :  { %1966 = vtanh.f32 %v942_v7 }
 0x3e0   :  { %1968 = vpow2.f32 %v1732_v48 }
 0x3e9   :  { %v1963_v34 = vpop.eup %1962 }
 0x3ea   :  { %v951_v61 = vadd.f32 1.0, %v1963_v34  ;;  %v2672_v34 = vld [vmem:[%s3023_s2 + $0xe0] ss:$16 sps:$4 sm:$0xff]  }
 0x3eb   :  { %v1965_v52 = vpop.eup %1964 }
 0x3ec   :  { %1970 = vrcp.f32 %v951_v61  ;;  %v957_v60 = vadd.f32 1.0, %v1965_v52  ;;  %v1967_v54 = vpop.eup %1966  ;;  %v2678_v61 = vld [vmem:[%s3023_s2 + $0xe8] ss:$16 sps:$4 sm:$0xff]   ;;  %v2684_v52 = vld [vmem:[%s3023_s2 + $0xc4] ss:$16 sps:$4 sm:$0xff]  }
 0x3ed   :  { %v1969_v58 = vpop.eup %1968 }
 0x3ee   :  { %1972 = vrcp.f32 %v957_v60  ;;  %v964_v46 = vadd.f32 1.0, %v1969_v58  ;;  %v2690_v60 = vld [vmem:[%s3023_s2 + $0xcc] ss:$16 sps:$4 sm:$0xff]   ;;  %v2704_v58 = vld [vmem:[%s3023_s2 + $0xc8] ss:$16 sps:$4 sm:$0xff]  }
 0x3f0   :  { %1974 = vrcp.f32 %v964_v46  ;;  %v2728_v46 = vld [vmem:[%s3023_s2 + $0xa8] ss:$16 sps:$4 sm:$0xff]  }
 0x3f9   :  { %v1971_v25 = vpop.eup %1970 }
 0x3fa   :  { %v968_v51 = vmul.f32 %v1971_v25, %v1967_v54  ;;  %v2698_v54 = vld [vmem:[%s3023_s2 + $0xc0] ss:$16 sps:$4 sm:$0xff]   ;;  %v2710_v25 = vld [vmem:[%s3023_s2 + $0xa4] ss:$16 sps:$4 sm:$0xff]  }
 0x3fb   :  { %v1973_v2 = vpop.eup %1972 }
 0x3fc   :  { %v967_v56 = vmul.f32 %v1973_v2, %v2572_v41  ;;  %v2722_v2 = vld [vmem:[%s3023_s2 + $0xa0] ss:$16 sps:$4 sm:$0xff]  }
 0x3fd   :  { %v1975_v42 = vpop.eup %1974 }
 0x3fe   :  { %v2614_v0 = vadd.f32 %v968_v51, %v967_v56  ;;  %v2716_v51 = vld [vmem:[%s3023_s2 + $0xac] ss:$16 sps:$4 sm:$0xff]   ;;  %v2734_v56 = vld [vmem:[%s3023_s2 + $0x84] ss:$16 sps:$4 sm:$0xff]  }
 0x400   :  { %1976 = vtanh.f32 %v2614_v0 }
 0x40d   :  { %v1977_v5 = vpop.eup %1976 }
 0x40e   :  { %v971_v44 = vmul.f32 %v1977_v5, %v1975_v42  ;;  %v2746_v42 = vld [vmem:[%s3023_s2 + $0x80] ss:$16 sps:$4 sm:$0xff]   ;;  %v2752_v5 = vld [vmem:[%s3023_s2 + $0x88] ss:$16 sps:$4 sm:$0xff]  }
 0x410   :  { %v979_v62 = vpack.c.bf16 %v971_v44, %v971_v44  ;;  %v2758_v44 = vld [vmem:[%s3023_s2 + $0x64] ss:$16 sps:$4 sm:$0xff]  }
 0x412   :  { %1020 = vmatmul.mubr.bf16.vlgmr.msra.gmra.mxu0 %v979_v62  ;;  %1061 = vmatmul.mubr.bf16.vlgmr.msra.gmra.mxu1 %v979_v62  ;;  %v2764_v62 = vld [vmem:[%s3023_s2 + $0x6c] ss:$16 sps:$4 sm:$0xff]  }
 0x413   :  { %1109 = vmatpush1.bf16.msra.mxu0 %v2157_v8  ;;  %1150 = vmatpush1.bf16.msra.mxu1 %v2163_v9  ;;  %v2652_v8 = vld [vmem:[%s3023_s2 + $0xe4] ss:$16 sps:$4 sm:$0xff]   ;;  %v2658_v9 = vld [vmem:[%s3023_s2 + $0xec] ss:$16 sps:$4 sm:$0xff]  }
 0x414   :  { %1110 = vmatprep.subr.bf16.mxu0 %v2170_v10  ;;  %1151 = vmatprep.subr.bf16.mxu1 %v2177_v11 }
 0x415   :  { %1140 = vmatprep.mubr.bf16.mxu0 %v3051_v45  ;;  %1181 = vmatprep.mubr.bf16.mxu1 %v3051_v45 }
 0x417   :  { %1111 = vmatpush1.bf16.msra.mxu0 %v2182_v12  ;;  %1152 = vmatpush1.bf16.msra.mxu1 %v2187_v13  ;;  %v3057_v12 = vld [vmem:[#allocation10_spill] sm:$0xff] }
 0x418   :  { %1112 = vmatprep.subr.bf16.mxu0 %v2199_v15  ;;  %1153 = vmatprep.subr.bf16.mxu1 %v2205_v16 }
 0x41b   :  { %1113 = vmatpush1.bf16.msra.mxu0 %v2211_v17  ;;  %1154 = vmatpush1.bf16.msra.mxu1 %v2216_v18  ;;  %v3058_v18 = vld [vmem:[#allocation12_spill] sm:$0xff] }
 0x41c   :  { %1114 = vmatprep.subr.bf16.mxu0 %v2223_v19  ;;  %1155 = vmatprep.subr.bf16.mxu1 %v2229_v20 }
 0x41f   :  { %1115 = vmatpush1.bf16.msra.mxu0 %v2236_v21  ;;  %1156 = vmatpush1.bf16.msra.mxu1 %v2242_v22 }
 0x420   :  { %1116 = vmatprep.subr.bf16.mxu0 %v2250_v23  ;;  %1157 = vmatprep.subr.bf16.mxu1 %v2257_v24 }
 0x423   :  { %1117 = vmatpush1.bf16.msra.mxu0 %v2266_v26  ;;  %1158 = vmatpush1.bf16.msra.mxu1 %v2273_v27  ;;  %v3059_v26 = vld [vmem:[#allocation13_spill] sm:$0xff] }
 0x424   :  { %1118 = vmatprep.subr.bf16.mxu0 %v2278_v28  ;;  %1159 = vmatprep.subr.bf16.mxu1 %v2284_v29  ;;  %v3060_v28 = vld [vmem:[#allocation11_spill] sm:$0xff] }
 0x427   :  { %1119 = vmatpush1.bf16.msra.mxu0 %v2292_v30  ;;  %1160 = vmatpush1.bf16.msra.mxu1 %v2297_v31 }
 0x428   :  { %1120 = vmatprep.subr.bf16.mxu0 %v2305_v32  ;;  %1161 = vmatprep.subr.bf16.mxu1 %v2312_v33 }
 0x42b   :  { %1121 = vmatpush1.bf16.msra.mxu0 %v2321_v35  ;;  %1162 = vmatpush1.bf16.msra.mxu1 %v2328_v36 }
 0x42c   :  { %1122 = vmatprep.subr.bf16.mxu0 %v2333_v37  ;;  %1163 = vmatprep.subr.bf16.mxu1 %v2339_v38 }
 0x42f   :  { %1123 = vmatpush1.bf16.msra.mxu0 %v2347_v39  ;;  %1164 = vmatpush1.bf16.msra.mxu1 %v2355_v40 }
 0x430   :  { %1229 = vmatprep.subr.bf16.mxu0 %v2652_v8  ;;  %1270 = vmatprep.subr.bf16.mxu1 %v2658_v9 }
 0x4d2   :  { %v1021_v10 = vpop.f32.mrf.mxu0  ;;  %v1062_v11 = vpop.f32.mrf.mxu1 }
 0x4d3   :  { %v1022_v13 = vadd.f32 %v1021_v10, %v3057_v12  ;;  %v1063_v29 = vadd.f32 %v1062_v11, %v3060_v28  ;;  %v2770_v10 = vld [vmem:[%s3023_s2 + $0x60] ss:$16 sps:$4 sm:$0xff]   ;;  %v2776_v11 = vld [vmem:[%s3023_s2 + $0x68] ss:$16 sps:$4 sm:$0xff]   ;;  %v2782_v12 = vld [vmem:[%s3023_s2 + $0x44] ss:$16 sps:$4 sm:$0xff]  }
 0x4d4   :  { %v1023_v15 = vpop.f32.mrf.mxu0  ;;  %v1064_v16 = vpop.f32.mrf.mxu1 }
 0x4d5   :  { %v1733_v17 = vmul.f32 -1.442695, %v1022_v13  ;;  %v1024_v19 = vadd.f32 %v1023_v15, %v3058_v18  ;;  %v1065_v27 = vadd.f32 %v1064_v16, %v3059_v26  ;;  %v2788_v13 = vld [vmem:[%s3023_s2 + $0x4c] ss:$16 sps:$4 sm:$0xff]   ;;  %v2794_v15 = vld [vmem:[%s3023_s2 + $0x40] ss:$16 sps:$4 sm:$0xff]  }
 0x4d6   :  { %v1025_v20 = vpop.f32.mrf.mxu0  ;;  %v1066_v21 = vpop.f32.mrf.mxu1  ;;  %v2800_v16 = vld [vmem:[%s3023_s2 + $0x48] ss:$16 sps:$4 sm:$0xff]  }
 0x4d7   :  { %1978 = vpow2.f32 %v1733_v17  ;;  %v1734_v22 = vmul.f32 -1.442695, %v1024_v19  ;;  %v1735_v30 = vmul.f32 -1.442695, %v1065_v27  ;;  %v3061_v18 = vld [vmem:[#allocation14_spill] sm:$0xff] }
 0x4d8   :  { %v1026_v23 = vpop.f32.mrf.mxu0  ;;  %v1067_v24 = vpop.f32.mrf.mxu1 }
 0x4d9   :  { %1980 = vpow2.f32 %v1734_v22  ;;  %v3064_v24 = vld [vmem:[#allocation15_spill] sm:$0xff] }
 0x4da   :  { %1982 = vtanh.f32 %v1063_v29 }
 0x4db   :  { %1984 = vpow2.f32 %v1735_v30 }
 0x4e4   :  { %v1979_v31 = vpop.eup %1978 }
 0x4e5   :  { %v1072_v41 = vadd.f32 1.0, %v1979_v31 }
 0x4e6   :  { %v1981_v57 = vpop.eup %1980 }
 0x4e7   :  { %1986 = vrcp.f32 %v1072_v41  ;;  %v1078_v43 = vadd.f32 1.0, %v1981_v57  ;;  %v1983_v53 = vpop.eup %1982 }
 0x4e8   :  { %v1985_v55 = vpop.eup %1984 }
 0x4e9   :  { %1988 = vrcp.f32 %v1078_v43  ;;  %v1085_v49 = vadd.f32 1.0, %v1985_v55 }
 0x4eb   :  { %1990 = vrcp.f32 %v1085_v49 }
 0x4f4   :  { %v1987_v59 = vpop.eup %1986 }
 0x4f5   :  { %v1089_v1 = vmul.f32 %v1987_v59, %v1983_v53 }
 0x4f6   :  { %v1989_v63 = vpop.eup %1988 }
 0x4f7   :  { %v1088_v50 = vmul.f32 %v1989_v63, %v2614_v0  ;;  %v2740_v0 = vld [vmem:[%s3023_s2 + $0x8c] ss:$16 sps:$4 sm:$0xff]  }
 0x4f8   :  { %v1991_v6 = vpop.eup %1990 }
 0x4f9   :  { %v2666_v47 = vadd.f32 %v1089_v1, %v1088_v50 }
 0x4fb   :  { %1992 = vtanh.f32 %v2666_v47 }
 0x508   :  { %v1993_v4 = vpop.eup %1992 }
 0x509   :  { %v1092_v7 = vmul.f32 %v1993_v4, %v1991_v6  ;;  %v2072_v4 = vld [vmem:[%s3023_s2 + $0x20] ss:$16 sps:$4 sm:$0xff]  }
 0x50b   :  { %v1100_v48 = vpack.c.bf16 %v1092_v7, %v1092_v7  ;;  %v2073_v7 = vld [vmem:[%s3023_s2 + $0x28] ss:$16 sps:$4 sm:$0xff]  }
 0x50d   :  { %1141 = vmatmul.mubr.bf16.vlgmr.msra.gmra.mxu0 %v1100_v48  ;;  %1182 = vmatmul.mubr.bf16.vlgmr.msra.gmra.mxu1 %v1100_v48  ;;  %v2074_v48 = vld [vmem:[%s3023_s2 + $0x4] ss:$16 sps:$4 sm:$0xff]  }
 0x50e   :  { %1230 = vmatpush1.bf16.msra.mxu0 %v2672_v34  ;;  %1271 = vmatpush1.bf16.msra.mxu1 %v2678_v61 }
 0x50f   :  { %1231 = vmatprep.subr.bf16.mxu0 %v2684_v52  ;;  %1272 = vmatprep.subr.bf16.mxu1 %v2690_v60 }
 0x510   :  { %1261 = vmatprep.mubr.bf16.mxu0 %v3051_v45  ;;  %1302 = vmatprep.mubr.bf16.mxu1 %v3051_v45 }
 0x512   :  { %1232 = vmatpush1.bf16.msra.mxu0 %v2698_v54  ;;  %1273 = vmatpush1.bf16.msra.mxu1 %v2704_v58 }
 0x513   :  { %1233 = vmatprep.subr.bf16.mxu0 %v2710_v25  ;;  %1274 = vmatprep.subr.bf16.mxu1 %v2716_v51 }
 0x516   :  { %1234 = vmatpush1.bf16.msra.mxu0 %v2722_v2  ;;  %1275 = vmatpush1.bf16.msra.mxu1 %v2728_v46 }
 0x517   :  { %1235 = vmatprep.subr.bf16.mxu0 %v2734_v56  ;;  %1276 = vmatprep.subr.bf16.mxu1 %v2740_v0 }
 0x51a   :  { %1236 = vmatpush1.bf16.msra.mxu0 %v2746_v42  ;;  %1277 = vmatpush1.bf16.msra.mxu1 %v2752_v5 }
 0x51b   :  { %1237 = vmatprep.subr.bf16.mxu0 %v2758_v44  ;;  %1278 = vmatprep.subr.bf16.mxu1 %v2764_v62 }
 0x51e   :  { %1238 = vmatpush1.bf16.msra.mxu0 %v2770_v10  ;;  %1279 = vmatpush1.bf16.msra.mxu1 %v2776_v11 }
 0x51f   :  { %1239 = vmatprep.subr.bf16.mxu0 %v2782_v12  ;;  %1280 = vmatprep.subr.bf16.mxu1 %v2788_v13 }
 0x522   :  { %1240 = vmatpush1.bf16.msra.mxu0 %v2794_v15  ;;  %1281 = vmatpush1.bf16.msra.mxu1 %v2800_v16 }
 0x523   :  { %1241 = vmatprep.subr.bf16.mxu0 %v2305_v32  ;;  %1282 = vmatprep.subr.bf16.mxu1 %v2312_v33 }
 0x526   :  { %1242 = vmatpush1.bf16.msra.mxu0 %v2321_v35  ;;  %1283 = vmatpush1.bf16.msra.mxu1 %v2328_v36  ;;  %v3062_v36 = vld [vmem:[#allocation16_spill] sm:$0xff] }
 0x527   :  { %1243 = vmatprep.subr.bf16.mxu0 %v2333_v37  ;;  %1284 = vmatprep.subr.bf16.mxu1 %v2339_v38 }
 0x52a   :  { %1244 = vmatpush1.bf16.msra.mxu0 %v2347_v39  ;;  %1285 = vmatpush1.bf16.msra.mxu1 %v2355_v40  ;;  %v3063_v40 = vld [vmem:[#allocation17_spill] sm:$0xff] }
 0x52b   :  { %1350 = vmatprep.subr.bf16.mxu0 %v2652_v8  ;;  %1391 = vmatprep.subr.bf16.mxu1 %v2658_v9 }
 0x5cd   :  { %v1142_v17 = vpop.f32.mrf.mxu0  ;;  %v1183_v32 = vpop.f32.mrf.mxu1 }
 0x5ce   :  { %v1143_v33 = vadd.f32 %v1142_v17, %v3061_v18  ;;  %v1184_v9 = vadd.f32 %v1183_v32, %v3064_v24  ;;  %v2080_v24 = vmov 0.0  }
 0x5cf   :  { %v1144_v19 = vpop.f32.mrf.mxu0  ;;  %v1185_v35 = vpop.f32.mrf.mxu1 }
 0x5d0   :  { %v1736_v20 = vmul.f32 -1.442695, %v1143_v33  ;;  %v1145_v21 = vadd.f32 %v1144_v19, %v3062_v36  ;;  %v1186_v8 = vadd.f32 %v1185_v35, %v3063_v40 }
 0x5d1   :  { %v1146_v37 = vpop.f32.mrf.mxu0  ;;  %v1187_v22 = vpop.f32.mrf.mxu1 }
 0x5d2   :  { %1994 = vpow2.f32 %v1736_v20  ;;  %v1737_v38 = vmul.f32 -1.442695, %v1145_v21  ;;  %v1738_v26 = vmul.f32 -1.442695, %v1186_v8 }
 0x5d3   :  { %v1147_v39 = vpop.f32.mrf.mxu0  ;;  %v1188_v23 = vpop.f32.mrf.mxu1 }
 0x5d4   :  { %1996 = vpow2.f32 %v1737_v38 }
 0x5d5   :  { %1998 = vtanh.f32 %v1184_v9  ;;  %v1483_v9 = vld [vmem:[%s3025_s4 + $0x78] sm:$0xff] }
 0x5d6   :  { %2000 = vpow2.f32 %v1738_v26  ;;  %v1482_v26 = vld [vmem:[%s3025_s4 + $0x70] sm:$0xff] }
 0x5df   :  { %v1995_v27 = vpop.eup %1994 }
 0x5e0   :  { %v1193_v28 = vadd.f32 1.0, %v1995_v27  ;;  %v1481_v27 = vld [vmem:[%s3025_s4 + $0x68] sm:$0xff] }
 0x5e1   :  { %v1997_v29 = vpop.eup %1996 }
 0x5e2   :  { %2002 = vrcp.f32 %v1193_v28  ;;  %v1199_v30 = vadd.f32 1.0, %v1997_v29  ;;  %v1999_v31 = vpop.eup %1998  ;;  %v1480_v28 = vld [vmem:[%s3025_s4 + $0x60] sm:$0xff]  ;;  %v1479_v29 = vld [vmem:[%s3025_s4 + $0x58] sm:$0xff] }
 0x5e3   :  { %v2001_v41 = vpop.eup %2000 }
 0x5e4   :  { %2004 = vrcp.f32 %v1199_v30  ;;  %v1206_v55 = vadd.f32 1.0, %v2001_v41  ;;  %v1478_v30 = vld [vmem:[%s3025_s4 + $0x50] sm:$0xff]  ;;  %v1476_v41 = vld [vmem:[%s3025_s4 + $0x40] sm:$0xff] }
 0x5e6   :  { %2006 = vrcp.f32 %v1206_v55  ;;  %v1472_v55 = vld [vmem:[%s3025_s4 + $0x20] sm:$0xff] }
 0x5ef   :  { %v2003_v57 = vpop.eup %2002 }
 0x5f0   :  { %v1210_v43 = vmul.f32 %v2003_v57, %v1999_v31  ;;  %v1477_v31 = vld [vmem:[%s3025_s4 + $0x48] sm:$0xff]  ;;  %v1475_v57 = vld [vmem:[%s3025_s4 + $0x38] sm:$0xff] }
 0x5f1   :  { %v2005_v53 = vpop.eup %2004 }
 0x5f2   :  { %v1209_v59 = vmul.f32 %v2005_v53, %v2666_v47  ;;  %v2071_v47 = vld [vmem:[%s3023_s2 + $0x2c] ss:$16 sps:$4 sm:$0xff]  }
 0x5f3   :  { %v2007_v63 = vpop.eup %2006  ;;  %v1473_v53 = vld [vmem:[%s3025_s4 + $0x28] sm:$0xff] }
 0x5f4   :  { %v2818_v1 = vadd.f32 %v1210_v43, %v1209_v59  ;;  %v1474_v43 = vld [vmem:[%s3025_s4 + $0x30] sm:$0xff]  ;;  %v1471_v59 = vld [vmem:[%s3025_s4 + $0x18] sm:$0xff] }
 0x5f6   :  { %2008 = vtanh.f32 %v2818_v1 }
 0x603   :  { %v2009_v49 = vpop.eup %2008 }
 0x604   :  { %v1213_v50 = vmul.f32 %v2009_v49, %v2007_v63  ;;  %v1469_v63 = vld [vmem:[%s3025_s4 + $0x8] sm:$0xff]  ;;  %v1468_v49 = vld [vmem:[%s3025_s4] sm:$0xff] }
 0x606   :  { %v1221_v6 = vpack.c.bf16 %v1213_v50, %v1213_v50  ;;  %v1577_v50 = vld [vmem:[%s3026_s6 + $0x78] sm:$0xff] }
 0x608   :  { %1262 = vmatmul.mubr.bf16.vlgmr.msra.gmra.mxu0 %v1221_v6  ;;  %1303 = vmatmul.mubr.bf16.vlgmr.msra.gmra.mxu1 %v1221_v6  ;;  %v1576_v6 = vld [vmem:[%s3026_s6 + $0x70] sm:$0xff] }
 0x609   :  { %1351 = vmatpush1.bf16.msra.mxu0 %v2672_v34  ;;  %1392 = vmatpush1.bf16.msra.mxu1 %v2678_v61  ;;  %v2075_v34 = vld [vmem:[%s3023_s2 + $0xc] ss:$16 sps:$4 sm:$0xff]   ;;  %v2076_v61 = vld [vmem:[%s3023_s2] ss:$16 sps:$4 sm:$0xff]  }
 0x60a   :  { %1352 = vmatprep.subr.bf16.mxu0 %v2684_v52  ;;  %1393 = vmatprep.subr.bf16.mxu1 %v2690_v60  ;;  %v2077_v52 = vld [vmem:[%s3023_s2 + $0x8] ss:$16 sps:$4 sm:$0xff]  }
 0x60b   :  { %1382 = vmatprep.mubr.bf16.mxu0 %v3051_v45  ;;  %1423 = vmatprep.mubr.bf16.mxu1 %v3051_v45  ;;  %v2070_v45 = vld [vmem:[%s3023_s2 + $0x24] ss:$16 sps:$4 sm:$0xff]  }
 0x60d   :  { %1353 = vmatpush1.bf16.msra.mxu0 %v2698_v54  ;;  %1394 = vmatpush1.bf16.msra.mxu1 %v2704_v58  ;;  %v3065_v58 = vld [vmem:[#allocation18_spill] sm:$0xff] }
 0x60e   :  { %1354 = vmatprep.subr.bf16.mxu0 %v2710_v25  ;;  %1395 = vmatprep.subr.bf16.mxu1 %v2716_v51 }
 0x611   :  { %1355 = vmatpush1.bf16.msra.mxu0 %v2722_v2  ;;  %1396 = vmatpush1.bf16.msra.mxu1 %v2728_v46 }
 0x612   :  { %1356 = vmatprep.subr.bf16.mxu0 %v2734_v56  ;;  %1397 = vmatprep.subr.bf16.mxu1 %v2740_v0  ;;  %v3066_v56 = vld [vmem:[#allocation20_spill] sm:$0xff] }
 0x615   :  { %1357 = vmatpush1.bf16.msra.mxu0 %v2746_v42  ;;  %1398 = vmatpush1.bf16.msra.mxu1 %v2752_v5 }
 0x616   :  { %1358 = vmatprep.subr.bf16.mxu0 %v2758_v44  ;;  %1399 = vmatprep.subr.bf16.mxu1 %v2764_v62 }
 0x619   :  { %1359 = vmatpush1.bf16.msra.mxu0 %v2770_v10  ;;  %1400 = vmatpush1.bf16.msra.mxu1 %v2776_v11  ;;  %v3067_v11 = vld [vmem:[#allocation21_spill] sm:$0xff] }
 0x61a   :  { %1360 = vmatprep.subr.bf16.mxu0 %v2782_v12  ;;  %1401 = vmatprep.subr.bf16.mxu1 %v2788_v13  ;;  %v3068_v13 = vld [vmem:[#allocation19_spill] sm:$0xff] }
 0x61d   :  { %1361 = vmatpush1.bf16.msra.mxu0 %v2794_v15  ;;  %1402 = vmatpush1.bf16.msra.mxu1 %v2800_v16 }
 0x61e   :  { %1362 = vmatprep.subr.bf16.mxu0 %v2070_v45  ;;  %1403 = vmatprep.subr.bf16.mxu1 %v2071_v47  ;;  %v1575_v45 = vld [vmem:[%s3026_s6 + $0x68] sm:$0xff]  ;;  %v1574_v47 = vld [vmem:[%s3026_s6 + $0x60] sm:$0xff] }
 0x621   :  { %1363 = vmatpush1.bf16.msra.mxu0 %v2072_v4  ;;  %1404 = vmatpush1.bf16.msra.mxu1 %v2073_v7  ;;  %v1573_v4 = vld [vmem:[%s3026_s6 + $0x58] sm:$0xff]  ;;  %v1572_v7 = vld [vmem:[%s3026_s6 + $0x50] sm:$0xff] }
 0x622   :  { %1364 = vmatprep.subr.bf16.mxu0 %v2074_v48  ;;  %1405 = vmatprep.subr.bf16.mxu1 %v2075_v34  ;;  %v1571_v48 = vld [vmem:[%s3026_s6 + $0x48] sm:$0xff]  ;;  %v1570_v34 = vld [vmem:[%s3026_s6 + $0x40] sm:$0xff] }
 0x625   :  { %1365 = vmatpush1.bf16.msra.mxu0 %v2076_v61  ;;  %1406 = vmatpush1.bf16.msra.mxu1 %v2077_v52  ;;  %v1569_v61 = vld [vmem:[%s3026_s6 + $0x38] sm:$0xff]  ;;  %v1568_v52 = vld [vmem:[%s3026_s6 + $0x30] sm:$0xff] }
 0x626   :  { %1782 = vmatprep.subr.mxu0 %v2080_v24  ;;  %1817 = vmatprep.subr.mxu1 %v2080_v24 }
 0x6c8   :  { %v1263_v60 = vpop.f32.mrf.mxu0  ;;  %v1304_v54 = vpop.f32.mrf.mxu1 }
 0x6c9   :  { %v1264_v25 = vadd.f32 %v1263_v60, %v3065_v58  ;;  %v1305_v15 = vadd.f32 %v1304_v54, %v3068_v13  ;;  %v1567_v60 = vld [vmem:[%s3026_s6 + $0x28] sm:$0xff]  ;;  %v1566_v54 = vld [vmem:[%s3026_s6 + $0x20] sm:$0xff]  ;;  %v1565_v58 = vld [vmem:[%s3026_s6 + $0x18] sm:$0xff] }
 0x6ca   :  { %v1265_v51 = vpop.f32.mrf.mxu0  ;;  %v1306_v2 = vpop.f32.mrf.mxu1 }
 0x6cb   :  { %v1739_v46 = vmul.f32 -1.442695, %v1264_v25  ;;  %v1266_v0 = vadd.f32 %v1265_v51, %v3066_v56  ;;  %v1307_v12 = vadd.f32 %v1306_v2, %v3067_v11  ;;  %v3069_v2 = vld [vmem:[#allocation22_spill] sm:$0xff] }
 0x6cc   :  { %v1267_v42 = vpop.f32.mrf.mxu0  ;;  %v1308_v5 = vpop.f32.mrf.mxu1 }
 0x6cd   :  { %2010 = vpow2.f32 %v1739_v46  ;;  %v1740_v44 = vmul.f32 -1.442695, %v1266_v0  ;;  %v1741_v16 = vmul.f32 -1.442695, %v1307_v12 }
 0x6ce   :  { %v1268_v62 = vpop.f32.mrf.mxu0  ;;  %v1309_v10 = vpop.f32.mrf.mxu1 }
 0x6cf   :  { %2012 = vpow2.f32 %v1740_v44 }
 0x6d0   :  { %2014 = vtanh.f32 %v1305_v15  ;;  %v3070_v15 = vld [vmem:[#allocation23_spill] sm:$0xff] }
 0x6d1   :  { %2016 = vpow2.f32 %v1741_v16 }
 0x6da   :  { %v2011_v17 = vpop.eup %2010 }
 0x6db   :  { %v1314_v32 = vadd.f32 1.0, %v2011_v17 }
 0x6dc   :  { %v2013_v18 = vpop.eup %2012 }
 0x6dd   :  { %2018 = vrcp.f32 %v1314_v32  ;;  %v1320_v33 = vadd.f32 1.0, %v2013_v18  ;;  %v2015_v19 = vpop.eup %2014 }
 0x6de   :  { %v2017_v35 = vpop.eup %2016 }
 0x6df   :  { %2020 = vrcp.f32 %v1320_v33  ;;  %v1327_v37 = vadd.f32 1.0, %v2017_v35 }
 0x6e1   :  { %2022 = vrcp.f32 %v1327_v37 }
 0x6ea   :  { %v2019_v20 = vpop.eup %2018 }
 0x6eb   :  { %v1331_v36 = vmul.f32 %v2019_v20, %v2015_v19 }
 0x6ec   :  { %v2021_v21 = vpop.eup %2020 }
 0x6ed   :  { %v1330_v22 = vmul.f32 %v2021_v21, %v2818_v1  ;;  %v1470_v1 = vld [vmem:[%s3025_s4 + $0x10] sm:$0xff] }
 0x6ee   :  { %v2023_v39 = vpop.eup %2022 }
 0x6ef   :  { %v2874_v38 = vadd.f32 %v1331_v36, %v1330_v22 }
 0x6f1   :  { %2024 = vtanh.f32 %v2874_v38 }
 0x6fe   :  { %v2025_v23 = vpop.eup %2024 }
 0x6ff   :  { %v1334_v40 = vmul.f32 %v2025_v23, %v2023_v39 }
 0x701   :  { %v1342_v8 = vpack.c.bf16 %v1334_v40, %v1334_v40 }
 0x703   :  { %1383 = vmatmul.mubr.bf16.vlgmr.msra.gmra.mxu0 %v1342_v8  ;;  %1424 = vmatmul.mubr.bf16.vlgmr.msra.gmra.mxu1 %v1342_v8  ;;  %v1564_v8 = vld [vmem:[%s3026_s6 + $0x10] sm:$0xff] }
 0x704   :  { %1783 = vmatpush3.msra.mxu0 %v1483_v9  ;;  %1814 = vmatprep.mubr.msk.f32.mxu0 %vm2081_vm1, %v2080_v24  ;;  %v1563_v9 = vld [vmem:[%s3026_s6 + $0x8] sm:$0xff] }
 0x705   :  { %1784 = vmatprep.subr.mxu0 %v2080_v24  ;;  %1849 = vmatprep.mubr.msk.f32.mxu1 %vm2081_vm1, %v2080_v24 }
 0x706   :  { %1785 = vmatpush3.msra.mxu0 %v1482_v26  ;;  %1818 = vmatpush3.msra.mxu1 %v1577_v50  ;;  %v1745_v26 = vld [vmem:[%s3027_s5] ss:$0 sm:$0xff] }
 0x707   :  { %1786 = vmatprep.subr.mxu0 %v2080_v24  ;;  %1819 = vmatprep.subr.mxu1 %v2080_v24 }
 0x708   :  { %1787 = vmatpush3.msra.mxu0 %v1481_v27  ;;  %1820 = vmatpush3.msra.mxu1 %v1576_v6 }
 0x709   :  { %1788 = vmatprep.subr.mxu0 %v2080_v24  ;;  %1821 = vmatprep.subr.mxu1 %v2080_v24 }
 0x70a   :  { %1789 = vmatpush3.msra.mxu0 %v1480_v28  ;;  %1822 = vmatpush3.msra.mxu1 %v1575_v45 }
 0x70b   :  { %1790 = vmatprep.subr.mxu0 %v2080_v24  ;;  %1823 = vmatprep.subr.mxu1 %v2080_v24 }
 0x70c   :  { %1791 = vmatpush3.msra.mxu0 %v1479_v29  ;;  %1824 = vmatpush3.msra.mxu1 %v1574_v47 }
 0x70d   :  { %1792 = vmatprep.subr.mxu0 %v2080_v24  ;;  %1825 = vmatprep.subr.mxu1 %v2080_v24 }
 0x70e   :  { %1793 = vmatpush3.msra.mxu0 %v1478_v30  ;;  %1826 = vmatpush3.msra.mxu1 %v1573_v4 }
 0x70f   :  { %1794 = vmatprep.subr.mxu0 %v2080_v24  ;;  %1827 = vmatprep.subr.mxu1 %v2080_v24 }
 0x710   :  { %1795 = vmatpush3.msra.mxu0 %v1477_v31  ;;  %1828 = vmatpush3.msra.mxu1 %v1572_v7  ;;  %v1746_v31 = vld [vmem:[%s3028_s7] ss:$0 sm:$0xff] }
 0x711   :  { %1796 = vmatprep.subr.mxu0 %v2080_v24  ;;  %1829 = vmatprep.subr.mxu1 %v2080_v24 }
 0x712   :  { %1797 = vmatpush3.msra.mxu0 %v1476_v41  ;;  %1830 = vmatpush3.msra.mxu1 %v1571_v48 }
 0x713   :  { %1798 = vmatprep.subr.mxu0 %v2080_v24  ;;  %1831 = vmatprep.subr.mxu1 %v2080_v24 }
 0x714   :  { %1799 = vmatpush3.msra.mxu0 %v1475_v57  ;;  %1832 = vmatpush3.msra.mxu1 %v1570_v34 }
 0x715   :  { %1800 = vmatprep.subr.mxu0 %v2080_v24  ;;  %1833 = vmatprep.subr.mxu1 %v2080_v24 }
 0x716   :  { %1801 = vmatpush3.msra.mxu0 %v1474_v43  ;;  %1834 = vmatpush3.msra.mxu1 %v1569_v61 }
 0x717   :  { %1802 = vmatprep.subr.mxu0 %v2080_v24  ;;  %1835 = vmatprep.subr.mxu1 %v2080_v24 }
 0x718   :  { %1803 = vmatpush3.msra.mxu0 %v1473_v53  ;;  %1836 = vmatpush3.msra.mxu1 %v1568_v52 }
 0x719   :  { %1804 = vmatprep.subr.mxu0 %v2080_v24  ;;  %1837 = vmatprep.subr.mxu1 %v2080_v24 }
 0x71a   :  { %1805 = vmatpush3.msra.mxu0 %v1472_v55  ;;  %1838 = vmatpush3.msra.mxu1 %v1567_v60 }
 0x71b   :  { %1806 = vmatprep.subr.mxu0 %v2080_v24  ;;  %1839 = vmatprep.subr.mxu1 %v2080_v24 }
 0x71c   :  { %1807 = vmatpush3.msra.mxu0 %v1471_v59  ;;  %1840 = vmatpush3.msra.mxu1 %v1566_v54 }
 0x71d   :  { %1808 = vmatprep.subr.mxu0 %v2080_v24  ;;  %1841 = vmatprep.subr.mxu1 %v2080_v24 }
 0x71e   :  { %1809 = vmatpush3.msra.mxu0 %v1470_v1  ;;  %1842 = vmatpush3.msra.mxu1 %v1565_v58 }
 0x71f   :  { %1810 = vmatprep.subr.mxu0 %v2080_v24  ;;  %1843 = vmatprep.subr.mxu1 %v2080_v24 }
 0x720   :  { %1811 = vmatpush3.msra.mxu0 %v1469_v63  ;;  %1844 = vmatpush3.msra.mxu1 %v1564_v8 }
 0x721   :  { %1812 = vmatprep.subr.mxu0 %v2080_v24  ;;  %1845 = vmatprep.subr.mxu1 %v2080_v24 }
 0x722   :  { %1813 = vmatpush3.msra.mxu0 %v1468_v49  ;;  %1846 = vmatpush3.msra.mxu1 %v1563_v9 }
 0x723   :  { %1847 = vmatprep.subr.mxu1 %v2080_v24 }
 0x7c3   :  { %v1384_v25 = vpop.f32.mrf.mxu0  ;;  %v1425_v51 = vpop.f32.mrf.mxu1 }
 0x7c4   :  { %v1385_v46 = vadd.f32 %v1384_v25, %v3069_v2  ;;  %v1426_v16 = vadd.f32 %v1425_v51, %v3070_v15 }
 0x7c5   :  { %v1386_v56 = vpop.f32.mrf.mxu0  ;;  %v1427_v0 = vpop.f32.mrf.mxu1 }
 0x7c6   :  { %v1742_v42 = vmul.f32 -1.442695, %v1385_v46  ;;  %v1387_v5 = vadd.f32 %v1386_v56, %v2478_v3  ;;  %v1428_v13 = vadd.f32 %v1427_v0, %v2481_v14 }
 0x7c7   :  { %v1388_v44 = vpop.f32.mrf.mxu0  ;;  %v1429_v62 = vpop.f32.mrf.mxu1 }
 0x7c8   :  { %2026 = vpow2.f32 %v1742_v42  ;;  %v1743_v10 = vmul.f32 -1.442695, %v1387_v5  ;;  %v1744_v17 = vmul.f32 -1.442695, %v1428_v13 }
 0x7c9   :  { %v1389_v11 = vpop.f32.mrf.mxu0  ;;  %v1430_v12 = vpop.f32.mrf.mxu1 }
 0x7ca   :  { %2028 = vpow2.f32 %v1743_v10 }
 0x7cb   :  { %2030 = vtanh.f32 %v1426_v16 }
 0x7cc   :  { %2032 = vpow2.f32 %v1744_v17 }
 0x7d5   :  { %v2027_v32 = vpop.eup %2026 }
 0x7d6   :  { %v1435_v18 = vadd.f32 1.0, %v2027_v32 }
 0x7d7   :  { %v2029_v33 = vpop.eup %2028 }
 0x7d8   :  { %2034 = vrcp.f32 %v1435_v18  ;;  %v1441_v19 = vadd.f32 1.0, %v2029_v33  ;;  %v2031_v3 = vpop.eup %2030 }
 0x7d9   :  { %v2033_v35 = vpop.eup %2032 }
 0x7da   :  { %2036 = vrcp.f32 %v1441_v19  ;;  %v1448_v37 = vadd.f32 1.0, %v2033_v35 }
 0x7dc   :  { %2038 = vrcp.f32 %v1448_v37 }
 0x7e5   :  { %v2035_v20 = vpop.eup %2034 }
 0x7e6   :  { %v1452_v36 = vmul.f32 %v2035_v20, %v2031_v3 }
 0x7e7   :  { %v2037_v21 = vpop.eup %2036 }
 0x7e8   :  { %v1451_v22 = vmul.f32 %v2037_v21, %v2874_v38  ;;  %v1562_v38 = vld [vmem:[%s3026_s6] sm:$0xff] }
 0x7e9   :  { %v2039_v39 = vpop.eup %2038  ;;  %1848 = vmatpush3.msra.mxu1 %v1562_v38 }
 0x7ea   :  { %v1453_v14 = vadd.f32 %v1452_v36, %v1451_v22 }
 0x7ec   :  { %2040 = vtanh.f32 %v1453_v14 }
 0x7f9   :  { %v2041_v23 = vpop.eup %2040 }
 0x7fa   :  { %v1455_v40 = vmul.f32 %v2041_v23, %v2039_v39 }
 0x7fc   :  { %1815 = vmatmul.mubr.f32.vlgmr.msra.gmra.mxu0 %v1455_v40 }
 0x8bc   :  { %v1557_v27 = vpop.f32.mrf.mxu0 }
 0x8bd   :  { %v1558_v28 = vadd.f32 %v1745_v26, %v1557_v27 }
 0x8be   :  { %v1816_v29 = vpop.f32.mrf.mxu0 }
 0x8bf   :  { %v1561_v30 = vmax.f32 %v1558_v28, 0.0 }
 0x8c1   :  { %1850 = vmatmul.mubr.f32.vlgmr.msra.gmra.mxu1 %v1561_v30 }
 0x981   :  { %v1651_v41 = vpop.f32.mrf.mxu1 }
 0x982   :  { %v1652_v57 = vadd.f32 %v1746_v31, %v1651_v41 }
 0x983   :  { %v1851_v43 = vpop.f32.mrf.mxu1 }
 0x984   :  { %v1747_v53 = vmul.f32 -1.442695, %v1652_v57 }
 0x986   :  { %2042 = vpow2.f32 %v1747_v53 }
 0x993   :  { %v2043_v24 = vpop.eup %2042 }
 0x994   :  { %v1658_v55 = vadd.f32 1.0, %v2043_v24 }
 0x996   :  { %2044 = vrcp.f32 %v1658_v55 }
 0x9a3   :  { %v2045_v59 = vpop.eup %2044 }
 0x9a4   :  { %1661 = vst [vmem:[%s3029_s8] sm:$0xff] %v2045_v59 }

</bundles_post_ra>
